<compile_context>
chip_gen: v7x
topology: tpu7x:2x2x1
jax: 0.10.0
libtpu: 0.0.40
codegen_flags: <defaults>
</compile_context>

<pallas_src>
import math
from functools import partial

import jax
import jax.numpy as jnp
from jax.experimental import pallas as pl
from jax.experimental.pallas import tpu as pltpu


def _round_up(x, m):
    return (x + m - 1) // m * m


def _mha_kernel(q_ref, k_ref, v_ref,
                wq_ref, wk_ref, wv_ref, wo_ref,
                bq_ref, bk_ref, bv_ref, bo_ref,
                ctx_ref, attn_ref,
                k_cache, v_cache, ctx_acc, attn_acc,
                *, heads, head_dim, kv_valid, compute_dtype):
    qi = pl.program_id(1)
    h = pl.program_id(2)

    def cast(x):
        return x.astype(compute_dtype)

    @pl.when(h == 0)
    def _():
        ctx_acc[...] = jnp.zeros_like(ctx_acc)
        attn_acc[...] = jnp.zeros_like(attn_acc)

    # K/V projections once per (batch, head).  qi resets to 0 whenever the
    # batch index advances, and the qi axis is "arbitrary" (never sharded
    # across TensorCores), so the cache is always filled before it is read.
    @pl.when(qi == 0)
    def _():
        kh = jnp.dot(cast(k_ref[0]), cast(wk_ref[h]),
                     preferred_element_type=jnp.float32) + bk_ref[h]
        vh = jnp.dot(cast(v_ref[0]), cast(wv_ref[h]),
                     preferred_element_type=jnp.float32) + bv_ref[h]
        k_cache[h] = kh.astype(k_cache.dtype)
        v_cache[h] = vh.astype(v_cache.dtype)

    # Q projection for this q-tile; fold 1/sqrt(dh) into the [tq, dh] tensor
    # (cheaper than scaling the [tq, Lk] scores).
    scale = 1.0 / math.sqrt(head_dim)
    qh = (jnp.dot(cast(q_ref[0]), cast(wq_ref[h]),
                  preferred_element_type=jnp.float32) + bq_ref[h]) * scale

    scores = jax.lax.dot_general(
        cast(qh), k_cache[h], (((1,), (1,)), ((), ())),
        preferred_element_type=jnp.float32)                       # [tq, Lk_pad]

    if kv_valid < scores.shape[-1]:      # static: mask padded key columns
        col = jax.lax.broadcasted_iota(jnp.int32, scores.shape, 1)
        scores = jnp.where(col < kv_valid, scores, -1e30)

    m = jnp.max(scores, axis=-1, keepdims=True)
    p = jnp.exp(scores - m)
    attn = p * pl.reciprocal(jnp.sum(p, axis=-1, keepdims=True), approx=True)

    ctx_h = jnp.dot(cast(attn), v_cache[h],
                    preferred_element_type=jnp.float32)           # [tq, dh]

    # Fused output projection: accumulate this head's contribution.
    ctx_acc[...] += jnp.dot(cast(ctx_h), cast(wo_ref[h]),
                            preferred_element_type=jnp.float32)   # [tq, D]
    attn_acc[...] += attn

    @pl.when(h == heads - 1)
    def _():
        ctx_ref[0] = (ctx_acc[...] + bo_ref[...]).astype(ctx_ref.dtype)
        attn_ref[0] = (attn_acc[...] * (1.0 / heads)).astype(attn_ref.dtype)


def prepare_mha_params(in_proj_weight, in_proj_bias, out_proj_weight,
                       out_proj_bias, heads, *, compute_dtype=jnp.bfloat16):
    """One-time layout prep (PyTorch layout -> per-head slabs in HBM).

    Weights are stored in `compute_dtype` (bf16 default: fast MXU path, half
    the DMA bytes).  Biases stay f32 (added to f32 accumulators).
    Do NOT call per step."""
    d_model = out_proj_weight.shape[0]
    assert in_proj_weight.shape == (3 * d_model, d_model)
    assert d_model % heads == 0
    dh = d_model // heads

    wq, wk, wv = jnp.split(in_proj_weight, 3, axis=0)   # [D, D] (out, in)
    bq, bk, bv = jnp.split(in_proj_bias, 3, axis=0)     # [D]

    def per_head_in(w):    # [D, D] -> W^T sliced per head -> [H, D, dh]
        return (jnp.transpose(w).reshape(d_model, heads, dh)
                .transpose(1, 0, 2).astype(compute_dtype))

    def per_head_bias(b):  # [D] -> [H, 1, dh] (f32)
        return b.reshape(heads, 1, dh).astype(jnp.float32)

    return dict(
        heads=heads, d_model=d_model, head_dim=dh, compute_dtype=compute_dtype,
        wq=per_head_in(wq), wk=per_head_in(wk), wv=per_head_in(wv),
        bq=per_head_bias(bq), bk=per_head_bias(bk), bv=per_head_bias(bv),
        wo=(jnp.transpose(out_proj_weight)
            .reshape(heads, dh, d_model).astype(compute_dtype)),   # [H, dh, D]
        bo=out_proj_bias.reshape(1, d_model).astype(jnp.float32),
    )


def _choose_q_tiling(lq, max_tile=256):
    """Return (lq_padded, tile) with tile | lq_padded, tile <= max_tile."""
    if lq <= max_tile:
        return lq, lq                       # single tile equals the full dim
    best = 0
    for t in range(8, max_tile + 1, 8):     # largest multiple-of-8 divisor
        if lq % t == 0:
            best = t
    if best:
        return lq, best
    return _round_up(lq, 128), 128          # no nice divisor: pad + mask/slice


def mha_forward(params, query, key, value, mask=None, *, q_tile=None,
                attn_dtype=jnp.float32):
    """query/key/value: [B, L, d_model] (batch_first). Returns (context, attn_avg)."""
    del mask  # the original module's forward never forwards its mask argument
    B, Lq, D = query.shape
    Bk, Lk, Dk = key.shape
    Bv, Lv, Dv = value.shape
    heads, dh = params["heads"], params["head_dim"]
    compute_dtype = params["compute_dtype"]
    assert D == params["d_model"] and Dk == D and Dv == D
    assert Bk == B and Bv == B and Lv == Lk

    out_dtype = query.dtype

    # q tiling (never silently fall back to one enormous tile).
    if q_tile is not None and Lq % q_tile == 0:
        Lq_pad, tq = Lq, q_tile
    else:
        Lq_pad, tq = _choose_q_tiling(Lq)
    nq = Lq_pad // tq

    # Lane-dense attention output: pad Lk to a multiple of 128, mask in-kernel.
    Lk_pad = max(_round_up(Lk, 128), 128)

    def prep(x, l_pad):
        x = x.astype(compute_dtype)
        if l_pad != x.shape[1]:
            x = jnp.pad(x, ((0, 0), (0, l_pad - x.shape[1]), (0, 0)))
        return x

    q_in = prep(query, Lq_pad)
    k_in = prep(key, Lk_pad)
    v_in = prep(value, Lk_pad)

    grid = (B, nq, heads)
    kernel = partial(_mha_kernel, heads=heads, head_dim=dh, kv_valid=Lk,
                     compute_dtype=compute_dtype)

    c_item = jnp.dtype(compute_dtype).itemsize
    flops = B * (4 * Lk_pad * D * D          # K/V projections (once per batch)
                 + 2 * Lq_pad * D * D        # Q projection
                 + 4 * Lq_pad * Lk_pad * D   # QK^T + PV over all heads
                 + 2 * Lq_pad * D * D)       # fused output projection
    bytes_accessed = ((q_in.size + k_in.size + v_in.size) * c_item
                      + 4 * D * D * c_item + 4 * D * 4
                      + B * Lq_pad * D * jnp.dtype(out_dtype).itemsize
                      + B * Lq_pad * Lk_pad * jnp.dtype(attn_dtype).itemsize)
    cost = pl.CostEstimate(flops=int(flops),
                           transcendentals=int(B * heads * Lq_pad * Lk_pad),
                           bytes_accessed=int(bytes_accessed))

    # Explicit VMEM budget (double-buffered blocks + resident weights + scratch),
    # clamped to v7x's 64 MiB physical VMEM per TensorCore.
    vmem_est = (2 * (tq * D + 2 * Lk_pad * D) * c_item
                + 2 * 4 * D * D * c_item
                + 2 * Lk_pad * D * c_item
                + (tq * D + tq * Lk_pad) * 4
                + 2 * (tq * D * jnp.dtype(out_dtype).itemsize
                       + tq * Lk_pad * jnp.dtype(attn_dtype).itemsize))
    vmem_limit = int(min(max(2 * vmem_est, 32 * 1024 * 1024), 64 * 1024 * 1024))

    context, attn = pl.pallas_call(
        kernel,
        out_shape=(jax.ShapeDtypeStruct((B, Lq_pad, D), out_dtype),
                   jax.ShapeDtypeStruct((B, Lq_pad, Lk_pad), attn_dtype)),
        grid_spec=pltpu.PrefetchScalarGridSpec(
            num_scalar_prefetch=0,
            grid=grid,
            in_specs=[
                pl.BlockSpec((1, tq, D), lambda b, qi, h: (b, qi, 0)),      # q tile
                pl.BlockSpec((1, Lk_pad, D), lambda b, qi, h: (b, 0, 0)),   # key
                pl.BlockSpec((1, Lk_pad, D), lambda b, qi, h: (b, 0, 0)),   # value
                # Weight/bias slabs: constant index_map => DMA'd once, VMEM-resident.
                pl.BlockSpec((heads, D, dh), lambda b, qi, h: (0, 0, 0)),   # Wq^T
                pl.BlockSpec((heads, D, dh), lambda b, qi, h: (0, 0, 0)),   # Wk^T
                pl.BlockSpec((heads, D, dh), lambda b, qi, h: (0, 0, 0)),   # Wv^T
                pl.BlockSpec((heads, dh, D), lambda b, qi, h: (0, 0, 0)),   # Wo^T
                pl.BlockSpec((heads, 1, dh), lambda b, qi, h: (0, 0, 0)),   # bq
                pl.BlockSpec((heads, 1, dh), lambda b, qi, h: (0, 0, 0)),   # bk
                pl.BlockSpec((heads, 1, dh), lambda b, qi, h: (0, 0, 0)),   # bv
                pl.BlockSpec((1, D), lambda b, qi, h: (0, 0)),              # bo
            ],
            out_specs=[
                pl.BlockSpec((1, tq, D), lambda b, qi, h: (b, qi, 0)),       # context
                pl.BlockSpec((1, tq, Lk_pad), lambda b, qi, h: (b, qi, 0)),  # attn avg
            ],
            scratch_shapes=[
                pltpu.VMEM((heads, Lk_pad, dh), compute_dtype),  # K projection cache
                pltpu.VMEM((heads, Lk_pad, dh), compute_dtype),  # V projection cache
                pltpu.VMEM((tq, D), jnp.float32),                # context accumulator
                pltpu.VMEM((tq, Lk_pad), jnp.float32),           # attn accumulator
            ],
        ),
        # q-tile axis must stay "arbitrary": the K/V cache fill at qi == 0 must
        # precede qi > 0 on the executing core (batch stays "parallel" for v7x).
        compiler_params=pltpu.CompilerParams(
            dimension_semantics=("parallel", "arbitrary", "arbitrary"),
            vmem_limit_bytes=vmem_limit),
        cost_estimate=cost,
    )(q_in, k_in, v_in,
      params["wq"], params["wk"], params["wv"], params["wo"],
      params["bq"], params["bk"], params["bv"], params["bo"])

    if Lq_pad != Lq:
        context = context[:, :Lq, :]
        attn = attn[:, :Lq, :]
    if Lk_pad != Lk:
        attn = attn[:, :, :Lk]
    return context, attn


def mha_reference(query, key, value, in_proj_weight, in_proj_bias,
                  out_proj_weight, out_proj_bias, heads):
    """Pure-JAX reference matching nn.MultiheadAttention (eval, no mask)."""
    D = query.shape[-1]
    dh = D // heads
    wq, wk, wv = jnp.split(in_proj_weight, 3, axis=0)
    bq, bk, bv = jnp.split(in_proj_bias, 3, axis=0)
    qp = query @ wq.T + bq
    kp = key @ wk.T + bk
    vp = value @ wv.T + bv
    B, Lq, _ = query.shape
    Lk = key.shape[1]
    qh = qp.reshape(B, Lq, heads, dh).transpose(0, 2, 1, 3)
    kh = kp.reshape(B, Lk, heads, dh).transpose(0, 2, 1, 3)
    vh = vp.reshape(B, Lk, heads, dh).transpose(0, 2, 1, 3)
    scores = jnp.einsum("bhqd,bhkd->bhqk", qh, kh) / math.sqrt(dh)
    attn = jax.nn.softmax(scores, axis=-1)
    ctx = jnp.einsum("bhqk,bhkd->bhqd", attn, vh)
    ctx = ctx.transpose(0, 2, 1, 3).reshape(B, Lq, D)
    out = ctx @ out_proj_weight.T + out_proj_bias
    return out, attn.mean(axis=1)


if __name__ == "__main__":
    # Small but lane-friendly shapes: head_dim = 256 / 2 = 128.
    B, Lq, Lk = 2, 8, 8
    d_model, heads = 256, 2

    root = jax.random.PRNGKey(0)
    kq, kk, kv, kw, kb, kwo, kbo = jax.random.split(root, 7)

    query = jax.random.normal(kq, (B, Lq, d_model), dtype=jnp.float32)
    key = jax.random.normal(kk, (B, Lk, d_model), dtype=jnp.float32)
    value = jax.random.normal(kv, (B, Lk, d_model), dtype=jnp.float32)

    # PyTorch-layout parameters (xavier_uniform_ on in_proj_weight, as torch does).
    bound = math.sqrt(6.0 / (d_model + d_model))
    in_proj_weight = jax.random.uniform(kw, (3 * d_model, d_model),
                                        minval=-bound, maxval=bound,
                                        dtype=jnp.float32)
    in_proj_bias = 0.02 * jax.random.normal(kb, (3 * d_model,), dtype=jnp.float32)
    out_proj_weight = jax.random.uniform(kwo, (d_model, d_model),
                                         minval=-bound, maxval=bound,
                                         dtype=jnp.float32)
    out_proj_bias = 0.02 * jax.random.normal(kbo, (d_model,), dtype=jnp.float32)

    ref_ctx, ref_attn = mha_reference(query, key, value, in_proj_weight,
                                      in_proj_bias, out_proj_weight,
                                      out_proj_bias, heads)

    # f32 compute path: tighter correctness check.
    params_f32 = prepare_mha_params(in_proj_weight, in_proj_bias,
                                    out_proj_weight, out_proj_bias, heads,
                                    compute_dtype=jnp.float32)
    ctx32, attn32 = mha_forward(params_f32, query, key, value)
    ctx32 = jax.block_until_ready(ctx32)
    attn32 = jax.block_until_ready(attn32)
    assert ctx32.shape == (B, Lq, d_model)
    assert attn32.shape == (B, Lq, Lk)
    assert jnp.allclose(ctx32, ref_ctx, atol=1e-2, rtol=1e-2)
    assert jnp.allclose(attn32, ref_attn, atol=1e-2, rtol=1e-2)

    # Default bf16 MXU path (production config): looser tolerances.
    params_bf16 = prepare_mha_params(in_proj_weight, in_proj_bias,
                                     out_proj_weight, out_proj_bias, heads)
    ctx16, attn16 = mha_forward(params_bf16, query, key, value)
    ctx16 = jax.block_until_ready(ctx16)
    attn16 = jax.block_until_ready(attn16)
    assert jnp.allclose(ctx16, ref_ctx, atol=6e-2, rtol=6e-2)
    assert jnp.allclose(attn16, ref_attn, atol=3e-2, rtol=3e-2)

    print("KERNEL_OK")
</pallas_src>

<mosaic_0001>
module attributes {stable_mosaic.version = 11 : i64} {
  func.func @_mha_kernel(%arg0: i32, %arg1: i32, %arg2: i32, %arg3: memref<1x8x256xf32, #tpu.memory_space<vmem>>, %arg4: memref<1x128x256xf32, #tpu.memory_space<vmem>>, %arg5: memref<1x128x256xf32, #tpu.memory_space<vmem>>, %arg6: memref<2x256x128xf32, #tpu.memory_space<vmem>>, %arg7: memref<2x256x128xf32, #tpu.memory_space<vmem>>, %arg8: memref<2x256x128xf32, #tpu.memory_space<vmem>>, %arg9: memref<2x128x256xf32, #tpu.memory_space<vmem>>, %arg10: memref<2x1x128xf32, #tpu.memory_space<vmem>>, %arg11: memref<2x1x128xf32, #tpu.memory_space<vmem>>, %arg12: memref<2x1x128xf32, #tpu.memory_space<vmem>>, %arg13: memref<1x256xf32, #tpu.memory_space<vmem>>, %arg14: memref<1x8x256xf32, #tpu.memory_space<vmem>>, %arg15: memref<1x8x128xf32, #tpu.memory_space<vmem>>, %arg16: memref<2x128x128xf32, #tpu.memory_space<vmem>>, %arg17: memref<2x128x128xf32, #tpu.memory_space<vmem>>, %arg18: memref<8x256xf32, #tpu.memory_space<vmem>>, %arg19: memref<8x128xf32, #tpu.memory_space<vmem>>) attributes {dimension_semantics = [#tpu.dimension_semantics<parallel>, #tpu.dimension_semantics<arbitrary>, #tpu.dimension_semantics<arbitrary>], iteration_bounds = array<i64: 2, 1, 2>, scalar_prefetch = 0 : i64, scratch_operands = 4 : i64, tpu.core_type = #tpu.core_type<tc>, window_params = [{transform_indices = @transform_0, window_bounds = array<i64: 1, 8, 256>}, {transform_indices = @transform_1, window_bounds = array<i64: 1, 128, 256>}, {transform_indices = @transform_2, window_bounds = array<i64: 1, 128, 256>}, {pipeline_mode = #tpu.pipeline_mode<synchronous>, transform_indices = @transform_3, window_bounds = array<i64: 2, 256, 128>}, {pipeline_mode = #tpu.pipeline_mode<synchronous>, transform_indices = @transform_4, window_bounds = array<i64: 2, 256, 128>}, {pipeline_mode = #tpu.pipeline_mode<synchronous>, transform_indices = @transform_5, window_bounds = array<i64: 2, 256, 128>}, {pipeline_mode = #tpu.pipeline_mode<synchronous>, transform_indices = @transform_6, window_bounds = array<i64: 2, 128, 256>}, {pipeline_mode = #tpu.pipeline_mode<synchronous>, transform_indices = @transform_7, window_bounds = array<i64: 2, 1, 128>}, {pipeline_mode = #tpu.pipeline_mode<synchronous>, transform_indices = @transform_8, window_bounds = array<i64: 2, 1, 128>}, {pipeline_mode = #tpu.pipeline_mode<synchronous>, transform_indices = @transform_9, window_bounds = array<i64: 2, 1, 128>}, {pipeline_mode = #tpu.pipeline_mode<synchronous>, transform_indices = @transform_10, window_bounds = array<i64: 1, 256>}, {transform_indices = @transform_11, window_bounds = array<i64: 1, 8, 256>}, {transform_indices = @transform_12, window_bounds = array<i64: 1, 8, 128>}]} {
    %c0_i32 = arith.constant 0 : i32
    %0 = arith.cmpi eq, %arg2, %c0_i32 : i32
    %1 = arith.extui %0 : i1 to i32
    %c0_i32_0 = arith.constant 0 : i32
    %2 = arith.cmpi ne, %1, %c0_i32_0 : i32
    scf.if %2 {
      %cst_31 = arith.constant 0.000000e+00 : f32
      %55 = vector.broadcast %cst_31 : f32 to vector<8x256xf32>
      %c0_32 = arith.constant 0 : index
      %c0_33 = arith.constant 0 : index
      %56 = vector.load %arg18[%c0_32, %c0_33] : memref<8x256xf32, #tpu.memory_space<vmem>>, vector<8x256xf32>
      tpu.vector_store %arg18[%c0_32, %c0_33], %55 {strides = array<i32>} : memref<8x256xf32, #tpu.memory_space<vmem>>, vector<8x256xf32>,
      %cst_34 = arith.constant 0.000000e+00 : f32
      %57 = vector.broadcast %cst_34 : f32 to vector<8x128xf32>
      %c0_35 = arith.constant 0 : index
      %c0_36 = arith.constant 0 : index
      %58 = vector.load %arg19[%c0_35, %c0_36] : memref<8x128xf32, #tpu.memory_space<vmem>>, vector<8x128xf32>
      tpu.vector_store %arg19[%c0_35, %c0_36], %57 {strides = array<i32>} : memref<8x128xf32, #tpu.memory_space<vmem>>, vector<8x128xf32>,
    } else {
    }
    %c0_i32_1 = arith.constant 0 : i32
    %3 = arith.cmpi eq, %arg1, %c0_i32_1 : i32
    %4 = arith.extui %3 : i1 to i32
    %c0_i32_2 = arith.constant 0 : i32
    %5 = arith.cmpi ne, %4, %c0_i32_2 : i32
    scf.if %5 {
      %c0_31 = arith.constant 0 : index
      %c0_32 = arith.constant 0 : index
      %c0_33 = arith.constant 0 : index
      %55 = vector.load %arg4[%c0_31, %c0_32, %c0_33] : memref<1x128x256xf32, #tpu.memory_space<vmem>>, vector<1x128x256xf32>
      %56 = vector.shape_cast %55 : vector<1x128x256xf32> to vector<128x256xf32>
      %57 = arith.index_cast %arg2 : i32 to index
      %c0_34 = arith.constant 0 : index
      %c0_35 = arith.constant 0 : index
      %58 = vector.load %arg7[%57, %c0_34, %c0_35] : memref<2x256x128xf32, #tpu.memory_space<vmem>>, vector<1x256x128xf32>
      %59 = vector.shape_cast %58 : vector<1x256x128xf32> to vector<256x128xf32>
      %cst_36 = arith.constant dense<0.000000e+00> : vector<128x128xf32>
      %60 = tpu.matmul %56, %59, %cst_36 {dimension_numbers = #tpu.dot_dimension_numbers<[1], [0], [0], [1], [0, 0, 1, 1], [], []>} : vector<128x256xf32>, vector<256x128xf32>, vector<128x128xf32> -> vector<128x128xf32>
      %61 = arith.index_cast %arg2 : i32 to index
      %c0_37 = arith.constant 0 : index
      %c0_38 = arith.constant 0 : index
      %62 = vector.load %arg11[%61, %c0_37, %c0_38] : memref<2x1x128xf32, #tpu.memory_space<vmem>>, vector<1x1x128xf32>
      %63 = vector.shape_cast %62 : vector<1x1x128xf32> to vector<1x128xf32>
      %64 = vector.broadcast %63 : vector<1x128xf32> to vector<128x128xf32>
      %65 = arith.addf %60, %64 : vector<128x128xf32>
      %c0_39 = arith.constant 0 : index
      %c0_40 = arith.constant 0 : index
      %c0_41 = arith.constant 0 : index
      %66 = vector.load %arg5[%c0_39, %c0_40, %c0_41] : memref<1x128x256xf32, #tpu.memory_space<vmem>>, vector<1x128x256xf32>
      %67 = vector.shape_cast %66 : vector<1x128x256xf32> to vector<128x256xf32>
      %68 = arith.index_cast %arg2 : i32 to index
      %c0_42 = arith.constant 0 : index
      %c0_43 = arith.constant 0 : index
      %69 = vector.load %arg8[%68, %c0_42, %c0_43] : memref<2x256x128xf32, #tpu.memory_space<vmem>>, vector<1x256x128xf32>
      %70 = vector.shape_cast %69 : vector<1x256x128xf32> to vector<256x128xf32>
      %cst_44 = arith.constant dense<0.000000e+00> : vector<128x128xf32>
      %71 = tpu.matmul %67, %70, %cst_44 {dimension_numbers = #tpu.dot_dimension_numbers<[1], [0], [0], [1], [0, 0, 1, 1], [], []>} : vector<128x256xf32>, vector<256x128xf32>, vector<128x128xf32> -> vector<128x128xf32>
      %72 = arith.index_cast %arg2 : i32 to index
      %c0_45 = arith.constant 0 : index
      %c0_46 = arith.constant 0 : index
      %73 = vector.load %arg12[%72, %c0_45, %c0_46] : memref<2x1x128xf32, #tpu.memory_space<vmem>>, vector<1x1x128xf32>
      %74 = vector.shape_cast %73 : vector<1x1x128xf32> to vector<1x128xf32>
      %75 = vector.broadcast %74 : vector<1x128xf32> to vector<128x128xf32>
      %76 = arith.addf %71, %75 : vector<128x128xf32>
      %77 = arith.index_cast %arg2 : i32 to index
      %c0_47 = arith.constant 0 : index
      %c0_48 = arith.constant 0 : index
      %78 = vector.load %arg16[%77, %c0_47, %c0_48] : memref<2x128x128xf32, #tpu.memory_space<vmem>>, vector<1x128x128xf32>
      %79 = vector.shape_cast %78 : vector<1x128x128xf32> to vector<128x128xf32>
      %80 = vector.shape_cast %65 : vector<128x128xf32> to vector<1x128x128xf32>
      tpu.vector_store %arg16[%77, %c0_47, %c0_48], %80 {strides = array<i32>} : memref<2x128x128xf32, #tpu.memory_space<vmem>>, vector<1x128x128xf32>,
      %81 = arith.index_cast %arg2 : i32 to index
      %c0_49 = arith.constant 0 : index
      %c0_50 = arith.constant 0 : index
      %82 = vector.load %arg17[%81, %c0_49, %c0_50] : memref<2x128x128xf32, #tpu.memory_space<vmem>>, vector<1x128x128xf32>
      %83 = vector.shape_cast %82 : vector<1x128x128xf32> to vector<128x128xf32>
      %84 = vector.shape_cast %76 : vector<128x128xf32> to vector<1x128x128xf32>
      tpu.vector_store %arg17[%81, %c0_49, %c0_50], %84 {strides = array<i32>} : memref<2x128x128xf32, #tpu.memory_space<vmem>>, vector<1x128x128xf32>,
    } else {
    }
    %c0 = arith.constant 0 : index
    %c0_3 = arith.constant 0 : index
    %c0_4 = arith.constant 0 : index
    %6 = vector.load %arg3[%c0, %c0_3, %c0_4] : memref<1x8x256xf32, #tpu.memory_space<vmem>>, vector<1x8x256xf32>
    %7 = vector.shape_cast %6 : vector<1x8x256xf32> to vector<8x256xf32>
    %8 = arith.index_cast %arg2 : i32 to index
    %c0_5 = arith.constant 0 : index
    %c0_6 = arith.constant 0 : index
    %9 = vector.load %arg6[%8, %c0_5, %c0_6] : memref<2x256x128xf32, #tpu.memory_space<vmem>>, vector<1x256x128xf32>
    %10 = vector.shape_cast %9 : vector<1x256x128xf32> to vector<256x128xf32>
    %cst = arith.constant dense<0.000000e+00> : vector<8x128xf32>
    %11 = tpu.matmul %7, %10, %cst {dimension_numbers = #tpu.dot_dimension_numbers<[1], [0], [0], [1], [0, 0, 1, 1], [], []>} : vector<8x256xf32>, vector<256x128xf32>, vector<8x128xf32> -> vector<8x128xf32>
    %12 = arith.index_cast %arg2 : i32 to index
    %c0_7 = arith.constant 0 : index
    %c0_8 = arith.constant 0 : index
    %13 = vector.load %arg10[%12, %c0_7, %c0_8] : memref<2x1x128xf32, #tpu.memory_space<vmem>>, vector<1x1x128xf32>
    %14 = vector.shape_cast %13 : vector<1x1x128xf32> to vector<1x128xf32>
    %15 = vector.broadcast %14 : vector<1x128xf32> to vector<8x128xf32>
    %16 = arith.addf %11, %15 : vector<8x128xf32>
    %cst_9 = arith.constant 0.0883883461 : f32
    %17 = vector.broadcast %cst_9 : f32 to vector<8x128xf32>
    %18 = arith.mulf %16, %17 : vector<8x128xf32>
    %19 = arith.index_cast %arg2 : i32 to index
    %c0_10 = arith.constant 0 : index
    %c0_11 = arith.constant 0 : index
    %20 = vector.load %arg16[%19, %c0_10, %c0_11] : memref<2x128x128xf32, #tpu.memory_space<vmem>>, vector<1x128x128xf32>
    %21 = vector.shape_cast %20 : vector<1x128x128xf32> to vector<128x128xf32>
    %cst_12 = arith.constant dense<0.000000e+00> : vector<8x128xf32>
    %22 = tpu.matmul %18, %21, %cst_12 {dimension_numbers = #tpu.dot_dimension_numbers<[1], [1], [0], [0], [0, 0, 1, 0], [], []>} : vector<8x128xf32>, vector<128x128xf32>, vector<8x128xf32> -> vector<8x128xf32>
    %23 = tpu.iota {dimensions = array<i32: 1>} : vector<8x128xi32>
    %c8_i32 = arith.constant 8 : i32
    %24 = vector.broadcast %c8_i32 : i32 to vector<8x128xi32>
    %25 = arith.cmpi slt, %23, %24 : vector<8x128xi32>
    %cst_13 = arith.constant -1.000000e+30 : f32
    %26 = vector.broadcast %cst_13 : f32 to vector<8x128xf32>
    %27 = arith.select %25, %22, %26 : vector<8x128xi1>, vector<8x128xf32>
    %cst_14 = arith.constant dense<0xFF800000> : vector<8xf32>
    %28 = vector.multi_reduction <maximumf>, %27, %cst_14 [1] : vector<8x128xf32> to vector<8xf32>
    %29 = vector.shape_cast %28 : vector<8xf32> to vector<8x1xf32>
    %30 = vector.broadcast %29 : vector<8x1xf32> to vector<8x128xf32>
    %31 = arith.subf %27, %30 : vector<8x128xf32>
    %32 = math.exp %31 : vector<8x128xf32>
    %cst_15 = arith.constant dense<0.000000e+00> : vector<8xf32>
    %33 = vector.multi_reduction <add>, %32, %cst_15 [1] : vector<8x128xf32> to vector<8xf32>
    %34 = vector.shape_cast %33 : vector<8xf32> to vector<8x1xf32>
    %35 = tpu.reciprocal %34 {approx = true} : vector<8x1xf32> -> vector<8x1xf32>
    %36 = vector.broadcast %35 : vector<8x1xf32> to vector<8x128xf32>
    %37 = arith.mulf %32, %36 : vector<8x128xf32>
    %38 = arith.index_cast %arg2 : i32 to index
    %c0_16 = arith.constant 0 : index
    %c0_17 = arith.constant 0 : index
    %39 = vector.load %arg17[%38, %c0_16, %c0_17] : memref<2x128x128xf32, #tpu.memory_space<vmem>>, vector<1x128x128xf32>
    %40 = vector.shape_cast %39 : vector<1x128x128xf32> to vector<128x128xf32>
    %cst_18 = arith.constant dense<0.000000e+00> : vector<8x128xf32>
    %41 = tpu.matmul %37, %40, %cst_18 {dimension_numbers = #tpu.dot_dimension_numbers<[1], [0], [0], [1], [0, 0, 1, 1], [], []>} : vector<8x128xf32>, vector<128x128xf32>, vector<8x128xf32> -> vector<8x128xf32>
    %c0_19 = arith.constant 0 : index
    %c0_20 = arith.constant 0 : index
    %42 = vector.load %arg18[%c0_19, %c0_20] : memref<8x256xf32, #tpu.memory_space<vmem>>, vector<8x256xf32>
    %43 = arith.index_cast %arg2 : i32 to index
    %c0_21 = arith.constant 0 : index
    %c0_22 = arith.constant 0 : index
    %44 = vector.load %arg9[%43, %c0_21, %c0_22] : memref<2x128x256xf32, #tpu.memory_space<vmem>>, vector<1x128x256xf32>
    %45 = vector.shape_cast %44 : vector<1x128x256xf32> to vector<128x256xf32>
    %cst_23 = arith.constant dense<0.000000e+00> : vector<8x256xf32>
    %46 = tpu.matmul %41, %45, %cst_23 {dimension_numbers = #tpu.dot_dimension_numbers<[1], [0], [0], [1], [0, 0, 1, 1], [], []>} : vector<8x128xf32>, vector<128x256xf32>, vector<8x256xf32> -> vector<8x256xf32>
    %47 = arith.addf %42, %46 : vector<8x256xf32>
    %c0_24 = arith.constant 0 : index
    %c0_25 = arith.constant 0 : index
    %48 = vector.load %arg18[%c0_24, %c0_25] : memref<8x256xf32, #tpu.memory_space<vmem>>, vector<8x256xf32>
    tpu.vector_store %arg18[%c0_24, %c0_25], %47 {strides = array<i32>} : memref<8x256xf32, #tpu.memory_space<vmem>>, vector<8x256xf32>,
    %c0_26 = arith.constant 0 : index
    %c0_27 = arith.constant 0 : index
    %49 = vector.load %arg19[%c0_26, %c0_27] : memref<8x128xf32, #tpu.memory_space<vmem>>, vector<8x128xf32>
    %50 = arith.addf %49, %37 : vector<8x128xf32>
    %c0_28 = arith.constant 0 : index
    %c0_29 = arith.constant 0 : index
    %51 = vector.load %arg19[%c0_28, %c0_29] : memref<8x128xf32, #tpu.memory_space<vmem>>, vector<8x128xf32>
    tpu.vector_store %arg19[%c0_28, %c0_29], %50 {strides = array<i32>} : memref<8x128xf32, #tpu.memory_space<vmem>>, vector<8x128xf32>,
    %c1_i32 = arith.constant 1 : i32
    %52 = arith.cmpi eq, %arg2, %c1_i32 : i32
    %53 = arith.extui %52 : i1 to i32
    %c0_i32_30 = arith.constant 0 : i32
    %54 = arith.cmpi ne, %53, %c0_i32_30 : i32
    scf.if %54 {
      %c0_31 = arith.constant 0 : index
      %c0_32 = arith.constant 0 : index
      %55 = vector.load %arg18[%c0_31, %c0_32] : memref<8x256xf32, #tpu.memory_space<vmem>>, vector<8x256xf32>
      %c0_33 = arith.constant 0 : index
      %c0_34 = arith.constant 0 : index
      %56 = vector.load %arg13[%c0_33, %c0_34] : memref<1x256xf32, #tpu.memory_space<vmem>>, vector<1x256xf32>
      %57 = vector.broadcast %56 : vector<1x256xf32> to vector<8x256xf32>
      %58 = arith.addf %55, %57 : vector<8x256xf32>
      %c0_35 = arith.constant 0 : index
      %c0_36 = arith.constant 0 : index
      %c0_37 = arith.constant 0 : index
      %59 = vector.load %arg14[%c0_35, %c0_36, %c0_37] : memref<1x8x256xf32, #tpu.memory_space<vmem>>, vector<1x8x256xf32>
      %60 = vector.shape_cast %59 : vector<1x8x256xf32> to vector<8x256xf32>
      %61 = vector.shape_cast %58 : vector<8x256xf32> to vector<1x8x256xf32>
      tpu.vector_store %arg14[%c0_35, %c0_36, %c0_37], %61 {strides = array<i32>} : memref<1x8x256xf32, #tpu.memory_space<vmem>>, vector<1x8x256xf32>,
      %c0_38 = arith.constant 0 : index
      %c0_39 = arith.constant 0 : index
      %62 = vector.load %arg19[%c0_38, %c0_39] : memref<8x128xf32, #tpu.memory_space<vmem>>, vector<8x128xf32>
      %cst_40 = arith.constant 5.000000e-01 : f32
      %63 = vector.broadcast %cst_40 : f32 to vector<8x128xf32>
      %64 = arith.mulf %62, %63 : vector<8x128xf32>
      %c0_41 = arith.constant 0 : index
      %c0_42 = arith.constant 0 : index
      %c0_43 = arith.constant 0 : index
      %65 = vector.load %arg15[%c0_41, %c0_42, %c0_43] : memref<1x8x128xf32, #tpu.memory_space<vmem>>, vector<1x8x128xf32>
      %66 = vector.shape_cast %65 : vector<1x8x128xf32> to vector<8x128xf32>
      %67 = vector.shape_cast %64 : vector<8x128xf32> to vector<1x8x128xf32>
      tpu.vector_store %arg15[%c0_41, %c0_42, %c0_43], %67 {strides = array<i32>} : memref<1x8x128xf32, #tpu.memory_space<vmem>>, vector<1x8x128xf32>,
    } else {
    }
    return
  }
  func.func @transform_0(%arg0: i32, %arg1: i32, %arg2: i32) -> (i32, i32, i32) {
    %c0_i32 = arith.constant 0 : i32
    %c0_i32_0 = arith.constant 0 : i32
    return %arg0, %arg1, %c0_i32 : i32, i32, i32
  }
  func.func @transform_1(%arg0: i32, %arg1: i32, %arg2: i32) -> (i32, i32, i32) {
    %c0_i32 = arith.constant 0 : i32
    %c0_i32_0 = arith.constant 0 : i32
    %c0_i32_1 = arith.constant 0 : i32
    return %arg0, %c0_i32, %c0_i32_0 : i32, i32, i32
  }
  func.func @transform_2(%arg0: i32, %arg1: i32, %arg2: i32) -> (i32, i32, i32) {
    %c0_i32 = arith.constant 0 : i32
    %c0_i32_0 = arith.constant 0 : i32
    %c0_i32_1 = arith.constant 0 : i32
    return %arg0, %c0_i32, %c0_i32_0 : i32, i32, i32
  }
  func.func @transform_3(%arg0: i32, %arg1: i32, %arg2: i32) -> (i32, i32, i32) {
    %c0_i32 = arith.constant 0 : i32
    %c0_i32_0 = arith.constant 0 : i32
    %c0_i32_1 = arith.constant 0 : i32
    %c0_i32_2 = arith.constant 0 : i32
    return %c0_i32, %c0_i32_0, %c0_i32_1 : i32, i32, i32
  }
  func.func @transform_4(%arg0: i32, %arg1: i32, %arg2: i32) -> (i32, i32, i32) {
    %c0_i32 = arith.constant 0 : i32
    %c0_i32_0 = arith.constant 0 : i32
    %c0_i32_1 = arith.constant 0 : i32
    %c0_i32_2 = arith.constant 0 : i32
    return %c0_i32, %c0_i32_0, %c0_i32_1 : i32, i32, i32
  }
  func.func @transform_5(%arg0: i32, %arg1: i32, %arg2: i32) -> (i32, i32, i32) {
    %c0_i32 = arith.constant 0 : i32
    %c0_i32_0 = arith.constant 0 : i32
    %c0_i32_1 = arith.constant 0 : i32
    %c0_i32_2 = arith.constant 0 : i32
    return %c0_i32, %c0_i32_0, %c0_i32_1 : i32, i32, i32
  }
  func.func @transform_6(%arg0: i32, %arg1: i32, %arg2: i32) -> (i32, i32, i32) {
    %c0_i32 = arith.constant 0 : i32
    %c0_i32_0 = arith.constant 0 : i32
    %c0_i32_1 = arith.constant 0 : i32
    %c0_i32_2 = arith.constant 0 : i32
    return %c0_i32, %c0_i32_0, %c0_i32_1 : i32, i32, i32
  }
  func.func @transform_7(%arg0: i32, %arg1: i32, %arg2: i32) -> (i32, i32, i32) {
    %c0_i32 = arith.constant 0 : i32
    %c0_i32_0 = arith.constant 0 : i32
    %c0_i32_1 = arith.constant 0 : i32
    %c0_i32_2 = arith.constant 0 : i32
    return %c0_i32, %c0_i32_0, %c0_i32_1 : i32, i32, i32
  }
  func.func @transform_8(%arg0: i32, %arg1: i32, %arg2: i32) -> (i32, i32, i32) {
    %c0_i32 = arith.constant 0 : i32
    %c0_i32_0 = arith.constant 0 : i32
    %c0_i32_1 = arith.constant 0 : i32
    %c0_i32_2 = arith.constant 0 : i32
    return %c0_i32, %c0_i32_0, %c0_i32_1 : i32, i32, i32
  }
  func.func @transform_9(%arg0: i32, %arg1: i32, %arg2: i32) -> (i32, i32, i32) {
    %c0_i32 = arith.constant 0 : i32
    %c0_i32_0 = arith.constant 0 : i32
    %c0_i32_1 = arith.constant 0 : i32
    %c0_i32_2 = arith.constant 0 : i32
    return %c0_i32, %c0_i32_0, %c0_i32_1 : i32, i32, i32
  }
  func.func @transform_10(%arg0: i32, %arg1: i32, %arg2: i32) -> (i32, i32) {
    %c0_i32 = arith.constant 0 : i32
    %c0_i32_0 = arith.constant 0 : i32
    %c0_i32_1 = arith.constant 0 : i32
    return %c0_i32, %c0_i32_0 : i32, i32
  }
  func.func @transform_11(%arg0: i32, %arg1: i32, %arg2: i32) -> (i32, i32, i32) {
    %c0_i32 = arith.constant 0 : i32
    %c0_i32_0 = arith.constant 0 : i32
    return %arg0, %arg1, %c0_i32 : i32, i32, i32
  }
  func.func @transform_12(%arg0: i32, %arg1: i32, %arg2: i32) -> (i32, i32, i32) {
    %c0_i32 = arith.constant 0 : i32
    %c0_i32_0 = arith.constant 0 : i32
    return %arg0, %arg1, %c0_i32 : i32, i32, i32
  }
}

</mosaic_0001>

<bundles_post_ra>
// kernel: tpu_custom_call.1
= control target key start
LH: loop header
LB: loop body
LE: loop exit
PB: predicated region body
PF: predicated region fallthrough
CT: control target
= control target key end

     0   :  { %s3603_s0 = inlined_call_operand.hbm [shape: f32[2,8,256], index: 0, kind: input, shape index: {}]   ;;  %s3604_s1 = inlined_call_operand.hbm [shape: f32[2,128,256], index: 1, kind: input, shape index: {}]   ;;  %s3605_s2 = inlined_call_operand.hbm [shape: f32[2,128,256], index: 2, kind: input, shape index: {}]   ;;  %s3606_s3 = inlined_call_operand.hbm [shape: f32[2,256,128], index: 3, kind: input, shape index: {}]   ;;  %s3607_s4 = inlined_call_operand.hbm [shape: f32[2,256,128], index: 4, kind: input, shape index: {}]   ;;  %s3608_s5 = inlined_call_operand.hbm [shape: f32[2,256,128], index: 5, kind: input, shape index: {}]   ;;  %s3609_s6 = inlined_call_operand.hbm [shape: f32[2,128,256], index: 6, kind: input, shape index: {}]   ;;  %s3610_s7 = inlined_call_operand.vmem [shape: f32[2,1,128], index: 7, kind: input, shape index: {}]   ;;  %s3611_s8 = inlined_call_operand.vmem [shape: f32[2,1,128], index: 8, kind: input, shape index: {}]   ;;  %s3612_s9 = inlined_call_operand.vmem [shape: f32[2,1,128], index: 9, kind: input, shape index: {}]   ;;  %s3613_s10 = inlined_call_operand.vmem [shape: f32[1,256], index: 10, kind: input, shape index: {}]   ;;  %s3614_s11 = inlined_call_operand.hbm [shape: f32[2,8,256], index: 11, kind: output, shape index: {0}]   ;;  %s3615_s12 = inlined_call_operand.hbm [shape: f32[2,8,128], index: 12, kind: output, shape index: {1}]  }
   0x1   :  { %3649 = sst [smem:[#allocation39_spill]] %s3604_s1 }
   0x2   :  { %3650 = sst [smem:[#allocation40_spill]] %s3606_s3 }
   0x3   :  { %3651 = sst [smem:[#allocation41_spill]] %s3608_s5 }
   0x4   :  { %3652 = sst [smem:[#allocation42_spill]] %s3610_s7 }
   0x5   :  { %3653 = sst [smem:[#allocation43_spill]] %s3611_s8 }
   0x6   :  { %3654 = sst [smem:[#allocation44_spill]] %s3612_s9 }
   0x7   :  { %3655 = sst [smem:[#allocation45_spill]] %s3613_s10 }
   0x8   :  { %3656 = sst [smem:[#allocation46_spill]] %s3614_s11 }
   0x9   :  { %3657 = sst [smem:[#allocation47_spill]] %s3615_s12 }
   0xa   :  { %18 = vsyncpa [#allocation7], 0 }
   0xb   :  { %20 = vsyncpa [#allocation7 + $0x1], 0 }
   0xc   :  { %21 = vsyncpa [#allocation10], 0 }
   0xd   :  { %23 = vsyncpa [#allocation10 + $0x1], 0 }
   0xe   :  { %24 = vsyncpa [#allocation13], 0 }
   0xf   :  { %25 = vsyncpa [#allocation16], 0 }
  0x10   :  { %26 = vsyncpa [#allocation8], 0 }
  0x11   :  { %28 = vsyncpa [#allocation8 + $0x1], 0 }
  0x12   :  { %29 = vsyncpa [#allocation20], 0 }
  0x13   :  { %31 = vsyncpa [#allocation20 + $0x1], 0  ;;  %s2887_s21 = smov 0   ;;  %s2889_s22 = smov 0  }
  0x14   :  { %s2891_s23 = smov 0   ;;  %s2893_s24 = smov 0  }
  0x15   :  { %s2895_s25 = smov 0   ;;  %s2897_s26 = smov 0  }
  0x16   :  { %s2899_s27 = smov 0   ;;  %s2901_s28 = smov 0  }
  0x17 LB: > { %3658 = sst [smem:[#allocation27_spill]] %s2775_s21  ;;  %s2928_s29 = sadd.s32 4294967295, %s2803_s28   ;;  %s2803_s28 = sphi %s2901_s28, %s37_s28   ;;  %s2799_s27 = sphi %s2899_s27, %s3721_s27   ;;  %s2795_s26 = sphi %s2897_s26, %s3716_s26   ;;  %s2791_s25 = sphi %s2895_s25, %s3720_s25   ;;  %s2787_s24 = sphi %s2893_s24, %s3715_s24   ;;  %s2783_s23 = sphi %s2891_s23, %s3714_s23   ;;  %s2779_s22 = sphi %s2889_s22, %s3719_s22   ;;  %s2775_s21 = sphi %s2887_s21, %s3718_s21  }
  0x18   : > { %3659 = sst [smem:[#allocation28_spill]] %s2783_s23  ;;  %s1789_s30 = sadd.s32 4294967294, %s2803_s28  }
  0x19   : > { %3660 = sst [smem:[#allocation29_spill]] %s2787_s24  ;;  %p78_p0 = scmp.ne.s32.totalorder %s2779_s22, %s2775_s21 }
  0x1a   : > { %3661 = sst [smem:[#allocation30_spill]] %s2791_s25  ;;  %p3621_p1 = scmp.eq.s32.totalorder %s2928_s29, 0 }
  0x1b   : > { %3662 = sst [smem:[#allocation31_spill]] %s2795_s26  ;;  %p330_p3 = scmp.eq.s32.totalorder %s1789_s30, 3 }
  0x1c   : > { %3663 = sst [smem:[#allocation32_spill]] %s2803_s28  ;;  %p2937_p4 = por %p3621_p1, %p78_p0 }
  0x1d   : > { %3664 = sst [smem:[#allocation33_spill]] %s2928_s29  ;;  %p1790_p5 = scmp.ge.s32.totalorder %s2803_s28, 1 }
  0x1e   : > { %s3665_s13 = scalar_select %p2937_p4, 1, 0 }
  0x1f   : > { %p2942_p6 = por %p330_p3, %p78_p0  ;;  %p365_p7 = scmp.lt.s32.totalorder %s2803_s28, 5 }
  0x20   : > { %s2805_s16 = smov [#allocation12]   ;;  %s2806_s19 = smov [#allocation15]  }
  0x21   : > { %s3666_s14 = scalar_select %p2942_p6, 1, 0 }
  0x22   : > { %p2947_p8 = pnand %p1790_p5, %p365_p7  ;;  %s377_s17 = sshll.u32 %s2805_s16, 4  ;;  %s378_s17 = int_to_ptr.vmem [resolvable:$true] %s377_s17 }
  0x23   : > { %3667 = sst [smem:[#allocation34_spill]] %s3666_s14  ;;  %s403_s20 = sshll.u32 %s2806_s19, 4  ;;  %s2959_s20 = int_to_ptr.vmem [resolvable:$true] %s403_s20 }
  0x24   : > { %s3668_s15 = scalar_select %p2947_p8, 1, 0 }
  0x25   : > { %p2339_p9 = pneg %p2947_p8  ;;  %s3670_s3 = sld [smem:[#allocation40_spill]] }
  0x27   : > { %p2955_p10 = pnand %p2339_p9, %p3621_p1 }
  0x29   : > { %s3669_s18 = scalar_select %p2955_p10, 1, 0 }
  0x2a   : > { %p2969_p12 = pneg %p2955_p10 }
  0x2b   : > { %s2459_s21 = scalar_lea.hbm %s3670_s3, 8192 }
  0x2c   : > { %p2460_p11 = scmp.ne.s32.totalorder %s3670_s3, %s2459_s21  ;;  %p2466_p3 = scmp.lt.u32.totalorder %s2459_s21, %s3670_s3 }
  0x2d   : > { %s3671_s16 = scalar_select %p2969_p12, 1, 0 }
  0x2e   : > { %p2462_p13 = pnand %p2969_p12, %p2460_p11 }
  0x30   : > { %p2463_p0 = pneg %p2462_p13 }
  0x32   : > { %p2468_p5 = pnand %p2466_p3, %p2463_p0 }
  0x34   : > { %2471 = shalt.err (!%p2468_p5)
}
  0x35   : > { %s2472_s14 = scalar_lea.vmem %s378_s17, 8192  ;;  %p2480_p2 = scmp.lt.s32.totalorder %s378_s17, %s378_s17 }
  0x36   : > { %p2473_p7 = scmp.ne.s32.totalorder %s378_s17, %s2472_s14  ;;  %p2481_p6 = scmp.lt.s32.totalorder %s2472_s14, %s2472_s14 }
  0x38   : > { %p2475_p9 = pnand %p2473_p7, %p2969_p12  ;;  %p2482_p4 = por %p2481_p6, %p2480_p2 }
  0x3a   : > { %p2476_p1 = pneg %p2475_p9 }
  0x3c   : > { %p2483_p8 = pnand %p2482_p4, %p2476_p1 }
  0x3e   : > { %2486 = shalt.err (!%p2483_p8)
}
  0x3f   : > { %s3624_s11 = smov 128   ;;  %s3625_s12 = smov 8  }
  0x40   : > { %2342 = dma.hbm_to_vmem [thread:$0]  (!%p2955_p10), %s3670_s3, 8192, %s378_s17, [#allocation13], %s3624_s11, %s3624_s11, %s3625_s12  }
  0x41   : > { %s3672_s5 = sld [smem:[#allocation41_spill]] }
  0x47   : > { %s2487_s10 = scalar_lea.hbm %s3672_s5, 8192 }
  0x48   : > { %p2488_p1 = scmp.ne.s32.totalorder %s3672_s5, %s2487_s10  ;;  %p2494_p6 = scmp.lt.u32.totalorder %s2487_s10, %s3672_s5 }
  0x4a   : > { %p2490_p2 = pnand %p2488_p1, %p2969_p12 }
  0x4c   : > { %p2491_p4 = pneg %p2490_p2 }
  0x4e   : > { %p2496_p8 = pnand %p2494_p6, %p2491_p4 }
  0x50   : > { %2499 = shalt.err (!%p2496_p8)
}
  0x51   : > { %s2500_s17 = scalar_lea.vmem %s2959_s20, 8192  ;;  %p2508_p3 = scmp.lt.s32.totalorder %s2959_s20, %s2959_s20 }
  0x52   : > { %p2501_p11 = scmp.ne.s32.totalorder %s2959_s20, %s2500_s17  ;;  %p2509_p5 = scmp.lt.s32.totalorder %s2500_s17, %s2500_s17 }
  0x54   : > { %p2503_p13 = pnand %p2501_p11, %p2969_p12  ;;  %p2510_p7 = por %p2509_p5, %p2508_p3 }
  0x56   : > { %p2504_p0 = pneg %p2503_p13 }
  0x58   : > { %p2511_p9 = pnand %p2510_p7, %p2504_p0 }
  0x5a   : > { %2514 = shalt.err (!%p2511_p9)
}
  0x5b   : > { %2348 = dma.hbm_to_vmem [thread:$0]  (!%p2955_p10), %s3672_s5, 8192, %s2959_s20, [#allocation16], %s3624_s11, %s3624_s11, %s3625_s12  }
  0x5c   : > { %s49_s9 = sadd.s32 1, %s2795_s26  ;;  %s56_s10 = sadd.s32 1, %s2799_s27 }
  0x5d   : > { %p50_p1 = scmp.ge.s32.totalorder %s49_s9, 2  ;;  %s65_s21 = sadd.s32 1, %s2783_s23 }
  0x5e   : > { %p72_p2 = scmp.ne.s32.totalorder %s2783_s23, %s2779_s22  ;;  %p73_p4 = scmp.eq.s32.totalorder %s2803_s28, 0 }
  0x5f   : > { %s3723_s9 = smov (%p50_p1, %s49_s9), 0  ;;  %s3725_s10 = smov (!%p50_p1, %s56_s10), %s2799_s27 }
  0x60   : > { %3673 = sst [smem:[#allocation35_spill]] %s3723_s9  ;;  %p74_p6 = por %p73_p4, %p72_p2 }
  0x61   : > { %p3674_p8 = scmp.eq.s32.totalorder %s2928_s29, 3  ;;  %p58_p13 = scmp.ge.s32.totalorder %s3725_s10, 2 }
  0x62   : > { %p2373_p0 = scmp.lt.s32.totalorder %s2803_s28, 4  ;;  %s3033_s20 = sand.u32 1, %s2783_s23  }
  0x63   : > { %p3025_p11 = por %p3674_p8, %p72_p2  ;;  %s3727_s10 = smov (%p58_p13, %s3725_s10), 0 }
  0x64   : > { %3677 = sst [smem:[#allocation37_spill]] %s3727_s10  ;;  %p3035_p3 = pnand %p2373_p0, %p74_p6 }
  0x65   : > { %s3675_s25 = scalar_select %p3025_p11, 1, 0 }
  0x66   : > { %s3678_s30 = scalar_select %p3035_p3, 1, 0 }
  0x67   : > { %3676 = sst [smem:[#allocation36_spill]] %s3675_s25  ;;  %s60_s19 = ssub.s32 %s2799_s27, %s3727_s10 }
  0x68   : > { %s463_s14 = sand.u32 1, %s2803_s28   ;;  %p63_p5 = scmp.eq.s32.totalorder %s60_s19, 0 }
  0x69   : > { %s3627_s17 = sshll.u32 %s3033_s20, 8  ;;  %s3628_s8 = sshll.u32 %s2799_s27, 12 }
  0x6a   : > { %s3044_s7 = scalar_select %p63_p5, %s2783_s23, %s65_s21  }
  0x6b   : > { %s3680_s1 = sld [smem:[#allocation39_spill]]  ;;  %s467_s5 = scalar_lea.vmem [#allocation9], %s3627_s17 }
  0x6c   : > { %3679 = sst [smem:[#allocation38_spill]] %s3044_s7  ;;  %s474_s9 = sshll.u32 %s467_s5, 4  ;;  %s3056_s9 = int_to_ptr.vmem [resolvable:$true] %s474_s9 }
  0x6d   : > { %s3058_s19 = scalar_lea.sflag [#allocation10], %s463_s14  ;;  %p3064_p9 = pneg %p3035_p3 }
  0x6f   : > { %s3681_s10 = scalar_select %p3064_p9, 1, 0 }
  0x71   : > { %s3052_s3 = scalar_lea.hbm %s3680_s1, %s3628_s8  ;;  %s2520_s17 = scalar_lea.hbm %s3680_s1, 8192 }
  0x72   : > { %s2515_s21 = scalar_lea.hbm %s3052_s3, 4096  ;;  %p2521_p4 = scmp.lt.u32.totalorder %s3052_s3, %s3680_s1 }
  0x73   : > { %p2516_p7 = scmp.ne.s32.totalorder %s3052_s3, %s2515_s21  ;;  %p2522_p6 = scmp.lt.u32.totalorder %s2520_s17, %s2515_s21 }
  0x74   : > { %p2524_p13 = scmp.lt.u32.totalorder %s2515_s21, %s3052_s3 }
  0x75   : > { %p2518_p1 = pnand %p3064_p9, %p2516_p7  ;;  %p2523_p8 = por %p2522_p6, %p2521_p4 }
  0x77   : > { %p2519_p2 = pneg %p2518_p1  ;;  %p2525_p0 = por %p2524_p13, %p2523_p8 }
  0x79   : > { %p2526_p5 = pnand %p2525_p0, %p2519_p2 }
  0x7b   : > { %2529 = shalt.err (!%p2526_p5)
}
  0x7c   : > { %s2530_s14 = scalar_lea.vmem %s3056_s9, 4096  ;;  %s2809_s11 = smov [#allocation9]  }
  0x7d   : > { %p2531_p7 = scmp.ne.s32.totalorder %s3056_s9, %s2530_s14  ;;  %s2535_s12 = sshll.u32 %s2809_s11, 4  ;;  %s2536_s12 = int_to_ptr.vmem [resolvable:$false] %s2535_s12 }
  0x7e   : > { %s2537_s8 = scalar_lea.vmem %s2536_s12, 8192  ;;  %p2538_p10 = scmp.lt.s32.totalorder %s3056_s9, %s2536_s12 }
  0x7f   : > { %p2533_p1 = pnand %p2531_p7, %p3064_p9  ;;  %p2539_p12 = scmp.lt.s32.totalorder %s2537_s8, %s2530_s14 }
  0x81   : > { %p2534_p11 = pneg %p2533_p1  ;;  %p2540_p4 = por %p2539_p12, %p2538_p10 }
  0x83   : > { %p2541_p6 = pnand %p2540_p4, %p2534_p11 }
  0x85   : > { %2544 = shalt.err (!%p2541_p6)
}
  0x86   : > { %s3643_s17 = smov 256   ;;  %s2811_s21 = smov 16  }
  0x87   : > { %2358 = dma.hbm_to_vmem [thread:$0]  (!%p3035_p3), %s3052_s3, 4096, %s3056_s9, %s3058_s19, %s3643_s17, %s3643_s17, %s2811_s21  }
  0x88   : > { %s3682_s5 = sshll.u32 %s2799_s27, 12  ;;  %s3683_s8 = sshll.u32 %s3033_s20, 8 }
  0x89   : > { %s3096_s12 = scalar_lea.hbm %s3605_s2, %s3682_s5  ;;  %s3100_s1 = scalar_lea.vmem [#allocation11], %s3683_s8 }
  0x8a   : > { %s495_s26 = sshll.u32 %s3100_s1, 4  ;;  %s2812_s7 = smov [#allocation14]   ;;  %s3154_s26 = int_to_ptr.vmem [resolvable:$true] %s495_s26 }
  0x8b   : > { %s390_s23 = sshll.u32 %s2812_s7, 4  ;;  %s2813_s28 = smov [#allocation17]   ;;  %s391_s23 = int_to_ptr.vmem [resolvable:$true] %s390_s23 }
  0x8c   : > { %s416_s25 = sshll.u32 %s2813_s28, 4  ;;  %s2545_s3 = scalar_lea.hbm %s3607_s4, 8192  ;;  %s417_s25 = int_to_ptr.vmem [resolvable:$true] %s416_s25 }
  0x8d   : > { %p2546_p10 = scmp.ne.s32.totalorder %s3607_s4, %s2545_s3  ;;  %p3684_p12 = scmp.ne.s32.totalorder %s3671_s16, 0 }
  0x8e   : > { %p2552_p8 = scmp.lt.u32.totalorder %s2545_s3, %s3607_s4 }
  0x8f   : > { %p2548_p11 = pnand %p2546_p10, %p3684_p12 }
  0x91   : > { %p2549_p2 = pneg %p2548_p11 }
  0x93   : > { %p2554_p13 = pnand %p2552_p8, %p2549_p2 }
  0x95   : > { %2557 = shalt.err (!%p2554_p13)
}
  0x96   : > { %s2558_s7 = scalar_lea.vmem %s391_s23, 8192  ;;  %p2566_p1 = scmp.lt.s32.totalorder %s391_s23, %s391_s23 }
  0x97   : > { %p2559_p0 = scmp.ne.s32.totalorder %s391_s23, %s2558_s7  ;;  %p2567_p4 = scmp.lt.s32.totalorder %s2558_s7, %s2558_s7 }
  0x99   : > { %p2561_p5 = pnand %p2559_p0, %p3684_p12  ;;  %p2568_p6 = por %p2567_p4, %p2566_p1 }
  0x9b   : > { %p2562_p7 = pneg %p2561_p5 }
  0x9d   : > { %p2569_p3 = pnand %p2568_p6, %p2562_p7 }
  0x9f   : > { %2572 = shalt.err (!%p2569_p3)
}
  0xa0   : > { %p3685_p10 = scmp.ne.s32.totalorder %s3669_s18, 0  ;;  %s3686_s24 = smov 8  }
  0xa1   : > { %s3687_s28 = smov 128   ;;  %s2573_s3 = scalar_lea.hbm %s3609_s6, 8192 }
  0xa2   : > { %2345 = dma.hbm_to_vmem [thread:$0]  (!%p3685_p10), %s3607_s4, 8192, %s391_s23, [#allocation13], %s3687_s28, %s3687_s28, %s3686_s24  }
  0xa3   : > { %p2574_p11 = scmp.ne.s32.totalorder %s3609_s6, %s2573_s3  ;;  %p2580_p8 = scmp.lt.u32.totalorder %s2573_s3, %s3609_s6 }
  0xa5   : > { %p2576_p3 = pnand %p2574_p11, %p3684_p12 }
  0xa7   : > { %p2577_p2 = pneg %p2576_p3 }
  0xa9   : > { %p2582_p13 = pnand %p2580_p8, %p2577_p2 }
  0xab   : > { %2585 = shalt.err (!%p2582_p13)
}
  0xac   : > { %s2586_s29 = scalar_lea.vmem %s417_s25, 8192  ;;  %p2594_p1 = scmp.lt.s32.totalorder %s417_s25, %s417_s25 }
  0xad   : > { %p2587_p0 = scmp.ne.s32.totalorder %s417_s25, %s2586_s29  ;;  %p2595_p4 = scmp.lt.s32.totalorder %s2586_s29, %s2586_s29 }
  0xaf   : > { %p2589_p5 = pnand %p2587_p0, %p3684_p12  ;;  %p2596_p6 = por %p2595_p4, %p2594_p1 }
  0xb1   : > { %p2590_p7 = pneg %p2589_p5 }
  0xb3   : > { %p2597_p9 = pnand %p2596_p6, %p2590_p7 }
  0xb5   : > { %2600 = shalt.err (!%p2597_p9)
}
  0xb6   : > { %s3688_s23 = smov 256   ;;  %s1796_s16 = sshll.u32 %s3033_s20, 4 }
  0xb7   : > { %2351 = dma.hbm_to_vmem [thread:$0]  (!%p3685_p10), %s3609_s6, 8192, %s417_s25, [#allocation16], %s3688_s23, %s3688_s23, %s2811_s21  }
  0xb8   : > { %s1833_s17 = sshll.u32 %s2799_s27, 8  ;;  %s446_s18 = scalar_lea.vmem [#allocation6], %s1796_s16 }
  0xb9   : > { %s3150_s3 = scalar_lea.hbm %s3603_s0, %s1833_s17  ;;  %s456_s9 = sshll.u32 %s446_s18, 4  ;;  %s457_s9 = int_to_ptr.vmem [resolvable:$true] %s456_s9 }
  0xba   : > { %s443_s5 = scalar_lea.sflag [#allocation7], %s3033_s20  ;;  %s2601_s11 = scalar_lea.hbm %s3150_s3, 256 }
  0xbb   : > { %p2602_p9 = scmp.ne.s32.totalorder %s3150_s3, %s2601_s11  ;;  %p3689_p12 = scmp.ne.s32.totalorder %s3681_s10, 0 }
  0xbc   : > { %s2606_s29 = scalar_lea.hbm %s3603_s0, 512  ;;  %p2607_p3 = scmp.lt.u32.totalorder %s3150_s3, %s3603_s0 }
  0xbd   : > { %p2604_p10 = pnand %p2602_p9, %p3689_p12  ;;  %p2608_p2 = scmp.lt.u32.totalorder %s2606_s29, %s2601_s11 }
  0xbe   : > { %p2610_p13 = scmp.lt.u32.totalorder %s2601_s11, %s3150_s3 }
  0xbf   : > { %p2605_p11 = pneg %p2604_p10  ;;  %p2609_p8 = por %p2608_p2, %p2607_p3 }
  0xc1   : > { %p2611_p0 = por %p2610_p13, %p2609_p8 }
  0xc3   : > { %p2612_p5 = pnand %p2611_p0, %p2605_p11 }
  0xc5   : > { %2615 = shalt.err (!%p2612_p5)
}
  0xc6   : > { %s2616_s20 = scalar_lea.vmem %s457_s9, 256  ;;  %s2814_s28 = smov [#allocation6]  }
  0xc7   : > { %p2617_p7 = scmp.ne.s32.totalorder %s457_s9, %s2616_s20  ;;  %s2621_s16 = sshll.u32 %s2814_s28, 4  ;;  %s2622_s16 = int_to_ptr.vmem [resolvable:$false] %s2621_s16 }
  0xc8   : > { %s2623_s17 = scalar_lea.vmem %s2622_s16, 512  ;;  %p2624_p6 = scmp.lt.s32.totalorder %s457_s9, %s2622_s16 }
  0xc9   : > { %p2619_p1 = pnand %p2617_p7, %p3689_p12  ;;  %p2625_p9 = scmp.lt.s32.totalorder %s2623_s17, %s2616_s20 }
  0xcb   : > { %p2620_p4 = pneg %p2619_p1  ;;  %p2626_p10 = por %p2625_p9, %p2624_p6 }
  0xcd   : > { %p2627_p2 = pnand %p2626_p10, %p2620_p4 }
  0xcf   : > { %2630 = shalt.err (!%p2627_p2)
}
  0xd0   : > { %p3690_p3 = scmp.ne.s32.totalorder %s3678_s30, 0  ;;  %s2631_s14 = scalar_lea.hbm %s3096_s12, 4096 }
  0xd1   : > { %p2632_p11 = scmp.ne.s32.totalorder %s3096_s12, %s2631_s14  ;;  %s2636_s11 = scalar_lea.hbm %s3605_s2, 8192 }
  0xd2   : > { %2355 = dma.hbm_to_vmem [thread:$0]  (!%p3690_p3), %s3150_s3, 256, %s457_s9, %s443_s5  }
  0xd3   : > { %p2634_p8 = pnand %p2632_p11, %p3689_p12  ;;  %p2637_p0 = scmp.lt.u32.totalorder %s3096_s12, %s3605_s2 }
  0xd4   : > { %p2638_p5 = scmp.lt.u32.totalorder %s2636_s11, %s2631_s14  ;;  %p2640_p1 = scmp.lt.u32.totalorder %s2631_s14, %s3096_s12 }
  0xd5   : > { %p2635_p13 = pneg %p2634_p8 }
  0xd6   : > { %p2639_p7 = por %p2638_p5, %p2637_p0 }
  0xd8   : > { %p2641_p4 = por %p2640_p1, %p2639_p7 }
  0xda   : > { %p2642_p6 = pnand %p2641_p4, %p2635_p13 }
  0xdc   : > { %2645 = shalt.err (!%p2642_p6)
}
  0xdd   : > { %s2646_s3 = scalar_lea.vmem %s3154_s26, 4096  ;;  %s2815_s9 = smov [#allocation11]  }
  0xde   : > { %p2647_p9 = scmp.ne.s32.totalorder %s3154_s26, %s2646_s3  ;;  %s2651_s5 = sshll.u32 %s2815_s9, 4  ;;  %s2652_s5 = int_to_ptr.vmem [resolvable:$false] %s2651_s5 }
  0xdf   : > { %s2653_s29 = scalar_lea.vmem %s2652_s5, 8192  ;;  %p2654_p11 = scmp.lt.s32.totalorder %s3154_s26, %s2652_s5 }
  0xe0   : > { %p2649_p10 = pnand %p2647_p9, %p3689_p12  ;;  %p2655_p8 = scmp.lt.s32.totalorder %s2653_s29, %s2646_s3 }
  0xe2   : > { %p2650_p2 = pneg %p2649_p10  ;;  %p2656_p0 = por %p2655_p8, %p2654_p11 }
  0xe4   : > { %p2657_p5 = pnand %p2656_p0, %p2650_p2 }
  0xe6   : > { %2660 = shalt.err (!%p2657_p5)
}
  0xe7   : > { %2361 = dma.hbm_to_vmem [thread:$0]  (!%p3690_p3), %s3096_s12, 4096, %s3154_s26, %s3058_s19, %s3688_s23, %s3688_s23, %s2811_s21  }
  0xe8   : > { %p3691_p12 = scmp.ne.s32.totalorder %s3668_s15, 0 }
  0xe9   : > { %s3202_s10 = sand.u32 (!%p3691_p12), 1, %s2779_s22   ;;  %p3692_p13 = scmp.ne.s32.totalorder (!%p3691_p12), %s3665_s13, 0 }
  0xea   : > { %507 = sbr.rel (%p3691_p12) target bundleno = 1617 (0x651), region = 64  ;;  %s1806_s1 = sshll.u32 (!%p3691_p12), %s3202_s10, 4 }
  0xeb   : > { %s510_s24 = scalar_lea.sflag (!%p3691_p12), [#allocation7], %s3202_s10  ;;  %s3206_s20 = scalar_lea.vmem (!%p3691_p12), [#allocation6], %s1806_s1 }
  0xf1   : > { %2750 = dma.done.wait (%p3692_p13), %s510_s24, 256  }
  0xf2   : > { %2752 = vsyncadd (%p3692_p13), %s510_s24, 4294967040  ;;  %s3693_s30 = sld [smem:[#allocation33_spill]]  ;;  %s1807_s15 = sshll.u32 %s3202_s10, 8 }
  0xf3   : > { %s3214_s21 = scalar_lea.vmem [#allocation9], %s1807_s15 }
  0xf8   : > { %s518_s26 = sand.u32 1, %s3693_s30  }
  0xf9   : > { %s519_s19 = scalar_lea.sflag [#allocation10], %s518_s26 }
  0xfa   : > { %2754 = dma.done.wait (%p3692_p13), %s519_s19, 8192  }
  0xfb   : > { %2756 = vsyncadd (%p3692_p13), %s519_s19, 4294959104  ;;  %s3220_s12 = scalar_lea.vmem [#allocation11], %s1807_s15  ;;  %p3694_p3 = scmp.eq.s32.totalorder %s3693_s30, 0 }
  0xfd   : > { %2758 = dma.done.wait (%p3694_p3), [#allocation13], 16384   ;;  %p3695_p7 = pmov %p3694_p3 }
  0xfe   : > { %p3696_p1 = pmov %p3694_p3 }
  0xff   : > { %2760 = vsyncadd (%p3695_p7), [#allocation13], 4294950912 }
 0x100   : > { %2762 = dma.done.wait (%p3696_p1), [#allocation16], 16384   ;;  %p3697_p4 = pmov %p3696_p1 }
 0x101   : > { %s1814_s23 = sshll.u32 %s3202_s10, 3  ;;  %s3231_s28 = scalar_lea.vmem [#allocation18], %s1806_s1 }
 0x102   : > { %2764 = vsyncadd (%p3697_p4), [#allocation16], 4294950912  ;;  %s3233_s13 = scalar_lea.vmem [#allocation19], %s1814_s23  ;;  %s3698_s16 = sld [smem:[#allocation29_spill]] }
 0x108   : > { %p1815_p6 = scmp.ne.s32.totalorder %s3698_s16, 0 }
 0x109   : > { %v2816_v0 = vmov (!%p1815_p6), 0.0  }
 0x10a   : > { %606 = sbr.rel (%p1815_p6) target bundleno = 273 (0x111), region = 96  ;;  %607 = vst [vmem:[#allocation4] sm:$0xff] (!%p1815_p6), %v2816_v0  ;;  %608 = vst [vmem:[#allocation4 + $0x8] sm:$0xff] (!%p1815_p6), %v2816_v0 }
 0x10b   : > { %609 = vst [vmem:[#allocation5] sm:$0xff] (!%p1815_p6), %v2816_v0 }
 0x111 PF: > { %s3699_s17 = sld [smem:[#allocation29_spill]]  ;;  %v615_v1 = vld [vmem:[%s3214_s21 + $0x8] sm:$0xff]  ;;  %v614_v55 = vld [vmem:[%s3214_s21] sm:$0xff]  ;;  %v617_v59 = vld [vmem:[%s3214_s21 + $0x18] sm:$0xff]  ;;  %vm2818_vm0 = vmmov 0   ;;  %s3700_s3 = sld [smem:[#allocation43_spill]] }
 0x112   : > { %752 = vmatprep.mubr.f32.mxu0 %v615_v1  ;;  %s3701_s1 = sld [smem:[#allocation42_spill]]  ;;  %s3702_s26 = sld [smem:[#allocation44_spill]] }
 0x117   : > { %s3237_s14 = sshll.u32 %s3699_s17, 8  ;;  %s680_s9 = scalar_lea.vmem %s3700_s3, %s3699_s17 }
 0x118   : > { %s3241_s8 = scalar_lea.vmem [#allocation14], %s3237_s14  ;;  %s3276_s18 = scalar_lea.vmem [#allocation12], %s3237_s14 }
 0x119   : > { %v664_v2 = vld [vmem:[%s3241_s8 + $0x80] sm:$0xff]  ;;  %v665_v3 = vld [vmem:[%s3241_s8 + $0x88] sm:$0xff]  ;;  %v666_v7 = vld [vmem:[%s3241_s8 + $0x90] sm:$0xff]  ;;  %s3286_s11 = scalar_lea.vmem [#allocation15], %s3237_s14  ;;  %s1122_s24 = scalar_lea.vmem %s3701_s1, %s3699_s17 }
 0x11a   : > { %v648_v4 = vld [vmem:[%s3241_s8] sm:$0xff]  ;;  %v2137_v5 = vpack.c.bf16 %v665_v3, %v664_v2  ;;  %v649_v6 = vld [vmem:[%s3241_s8 + $0x8] sm:$0xff]  ;;  %v667_v8 = vld [vmem:[%s3241_s8 + $0x98] sm:$0xff]  ;;  %s898_s15 = scalar_lea.vmem %s3702_s26, %s3699_s17  ;;  %s3482_s19 = scalar_lea.vmem [#allocation17], %s3237_s14 }
 0x11b   : > { %v2139_v9 = vpack.c.bf16 %v649_v6, %v648_v4  ;;  %v2141_v10 = vpack.c.bf16 %v667_v8, %v666_v7  ;;  %v650_v11 = vld [vmem:[%s3241_s8 + $0x10] sm:$0xff]  ;;  %v651_v12 = vld [vmem:[%s3241_s8 + $0x18] sm:$0xff]  ;;  %v668_v13 = vld [vmem:[%s3241_s8 + $0xa0] sm:$0xff]  ;;  %p1825_p9 = scmp.ne.s32.totalorder %s3699_s17, 1 }
 0x11c   : > { %2138 = vmatprep.subr.bf16.mxu0 %v2137_v5  ;;  %v669_v14 = vld [vmem:[%s3241_s8 + $0xa8] sm:$0xff]  ;;  %v2143_v15 = vpack.c.bf16 %v651_v12, %v650_v11  ;;  %v652_v17 = vld [vmem:[%s3241_s8 + $0x20] sm:$0xff]  ;;  %v670_v19 = vld [vmem:[%s3241_s8 + $0xb0] sm:$0xff]  ;;  %s3703_s23 = sld [smem:[#allocation45_spill]] (!%p1825_p9) }
 0x11d   : > { %2140 = vmatpush3.bf16.msra.mxu0 %v2139_v9  ;;  %v2145_v16 = vpack.c.bf16 %v669_v14, %v668_v13  ;;  %v653_v18 = vld [vmem:[%s3241_s8 + $0x28] sm:$0xff]  ;;  %v671_v20 = vld [vmem:[%s3241_s8 + $0xb8] sm:$0xff]  ;;  %v654_v23 = vld [vmem:[%s3241_s8 + $0x30] sm:$0xff] }
 0x11e   : > { %2142 = vmatprep.subr.bf16.mxu0 %v2141_v10  ;;  %v2147_v21 = vpack.c.bf16 %v653_v18, %v652_v17  ;;  %v2149_v22 = vpack.c.bf16 %v671_v20, %v670_v19  ;;  %v655_v24 = vld [vmem:[%s3241_s8 + $0x38] sm:$0xff]  ;;  %v672_v25 = vld [vmem:[%s3241_s8 + $0xc0] sm:$0xff]  ;;  %v673_v26 = vld [vmem:[%s3241_s8 + $0xc8] sm:$0xff] }
 0x11f   : > { %v2151_v27 = vpack.c.bf16 %v655_v24, %v654_v23  ;;  %v2153_v28 = vpack.c.bf16 %v673_v26, %v672_v25  ;;  %v656_v29 = vld [vmem:[%s3241_s8 + $0x40] sm:$0xff]  ;;  %v657_v30 = vld [vmem:[%s3241_s8 + $0x48] sm:$0xff]  ;;  %v674_v31 = vld [vmem:[%s3241_s8 + $0xd0] sm:$0xff] }
 0x120   : > { %v675_v32 = vld [vmem:[%s3241_s8 + $0xd8] sm:$0xff]  ;;  %v2155_v33 = vpack.c.bf16 %v657_v30, %v656_v29  ;;  %v658_v35 = vld [vmem:[%s3241_s8 + $0x50] sm:$0xff]  ;;  %v676_v37 = vld [vmem:[%s3241_s8 + $0xe0] sm:$0xff] }
 0x121   : > { %2144 = vmatpush3.bf16.msra.mxu0 %v2143_v15  ;;  %v2157_v34 = vpack.c.bf16 %v675_v32, %v674_v31  ;;  %v659_v36 = vld [vmem:[%s3241_s8 + $0x58] sm:$0xff]  ;;  %v677_v38 = vld [vmem:[%s3241_s8 + $0xe8] sm:$0xff]  ;;  %v660_v41 = vld [vmem:[%s3241_s8 + $0x60] sm:$0xff] }
 0x122   : > { %2146 = vmatprep.subr.bf16.mxu0 %v2145_v16  ;;  %v2159_v39 = vpack.c.bf16 %v659_v36, %v658_v35  ;;  %v2161_v40 = vpack.c.bf16 %v677_v38, %v676_v37  ;;  %v661_v42 = vld [vmem:[%s3241_s8 + $0x68] sm:$0xff]  ;;  %v678_v43 = vld [vmem:[%s3241_s8 + $0xf0] sm:$0xff]  ;;  %v679_v44 = vld [vmem:[%s3241_s8 + $0xf8] sm:$0xff] }
 0x123   : > { %v2163_v45 = vpack.c.bf16 %v661_v42, %v660_v41  ;;  %v2165_v46 = vpack.c.bf16 %v679_v44, %v678_v43  ;;  %v662_v47 = vld [vmem:[%s3241_s8 + $0x70] sm:$0xff]  ;;  %v663_v48 = vld [vmem:[%s3241_s8 + $0x78] sm:$0xff]  ;;  %v1106_v49 = vld [vmem:[%s3276_s18 + $0x80] sm:$0xff] }
 0x124   : > { %v1107_v50 = vld [vmem:[%s3276_s18 + $0x88] sm:$0xff]  ;;  %v2167_v51 = vpack.c.bf16 %v663_v48, %v662_v47  ;;  %v1090_v53 = vld [vmem:[%s3276_s18] sm:$0xff]  ;;  %v1108_v56 = vld [vmem:[%s3276_s18 + $0x90] sm:$0xff] }
 0x125   : > { %2148 = vmatpush3.bf16.msra.mxu0 %v2147_v21  ;;  %v2201_v52 = vpack.c.bf16 %v1107_v50, %v1106_v49  ;;  %v1091_v54 = vld [vmem:[%s3276_s18 + $0x8] sm:$0xff]  ;;  %v1109_v57 = vld [vmem:[%s3276_s18 + $0x98] sm:$0xff]  ;;  %v882_v58 = vld [vmem:[%s3286_s11 + $0x80] sm:$0xff] }
 0x126   : > { %2150 = vmatprep.subr.bf16.mxu0 %v2149_v22  ;;  %v1092_v60 = vld [vmem:[%s3276_s18 + $0x10] sm:$0xff]  ;;  %v883_v61 = vld [vmem:[%s3286_s11 + $0x88] sm:$0xff]  ;;  %v866_v62 = vld [vmem:[%s3286_s11] sm:$0xff]  ;;  %v2203_v0 = vpack.c.bf16 %v1091_v54, %v1090_v53  ;;  %v2205_v6 = vpack.c.bf16 %v1109_v57, %v1108_v56 }
 0x127   : > { %v867_v63 = vld [vmem:[%s3286_s11 + $0x8] sm:$0xff]  ;;  %v2169_v1 = vpack.c.bf16 %v883_v61, %v882_v58  ;;  %v884_v3 = vld [vmem:[%s3286_s11 + $0x90] sm:$0xff]  ;;  %v885_v4 = vld [vmem:[%s3286_s11 + $0x98] sm:$0xff] }
 0x128   : > { %v2171_v2 = vpack.c.bf16 %v867_v63, %v866_v62  ;;  %v868_v5 = vld [vmem:[%s3286_s11 + $0x10] sm:$0xff]  ;;  %v1093_v7 = vld [vmem:[%s3276_s18 + $0x18] sm:$0xff]  ;;  %v1110_v8 = vld [vmem:[%s3276_s18 + $0xa0] sm:$0xff]  ;;  %v2173_v9 = vpack.c.bf16 %v885_v4, %v884_v3 }
 0x129   : > { %2152 = vmatpush3.bf16.msra.mxu0 %v2151_v27  ;;  %v869_v10 = vld [vmem:[%s3286_s11 + $0x18] sm:$0xff]  ;;  %v1111_v11 = vld [vmem:[%s3276_s18 + $0xa8] sm:$0xff]  ;;  %2170 = vmatprep.subr.bf16.mxu1 %v2169_v1  ;;  %v886_v12 = vld [vmem:[%s3286_s11 + $0xa0] sm:$0xff]  ;;  %v2207_v17 = vpack.c.bf16 %v1093_v7, %v1092_v60 }
 0x12a   : > { %2154 = vmatprep.subr.bf16.mxu0 %v2153_v28  ;;  %v887_v13 = vld [vmem:[%s3286_s11 + $0xa8] sm:$0xff]  ;;  %2172 = vmatpush3.bf16.msra.mxu1 %v2171_v2  ;;  %v2175_v15 = vpack.c.bf16 %v869_v10, %v868_v5  ;;  %v619_v16 = vld [vmem:[%s3214_s21 + $0x28] sm:$0xff]  ;;  %v2209_v20 = vpack.c.bf16 %v1111_v11, %v1110_v8  ;;  %v1112_v23 = vld [vmem:[%s3276_s18 + $0xb0] sm:$0xff] }
 0x12b   : > { %v616_v14 = vld [vmem:[%s3214_s21 + $0x10] sm:$0xff]  ;;  %v870_v18 = vld [vmem:[%s3286_s11 + $0x20] sm:$0xff]  ;;  %2174 = vmatprep.subr.bf16.mxu1 %v2173_v9  ;;  %v2177_v24 = vpack.c.bf16 %v887_v13, %v886_v12  ;;  %v1113_v25 = vld [vmem:[%s3276_s18 + $0xb8] sm:$0xff] }
 0x12c   : > { %v871_v19 = vld [vmem:[%s3286_s11 + $0x28] sm:$0xff]  ;;  %v1094_v21 = vld [vmem:[%s3276_s18 + $0x20] sm:$0xff]  ;;  %v888_v26 = vld [vmem:[%s3286_s11 + $0xb0] sm:$0xff] }
 0x12d   : > { %2156 = vmatpush3.bf16.msra.mxu0 %v2155_v33  ;;  %v1095_v22 = vld [vmem:[%s3276_s18 + $0x28] sm:$0xff]  ;;  %v889_v27 = vld [vmem:[%s3286_s11 + $0xb8] sm:$0xff]  ;;  %v2179_v29 = vpack.c.bf16 %v871_v19, %v870_v18  ;;  %v621_v30 = vld [vmem:[%s3214_s21 + $0x38] sm:$0xff] }
 0x12e   : > { %2158 = vmatprep.subr.bf16.mxu0 %v2157_v34  ;;  %v618_v28 = vld [vmem:[%s3214_s21 + $0x20] sm:$0xff]  ;;  %2176 = vmatpush3.bf16.msra.mxu1 %v2175_v15  ;;  %v2211_v31 = vpack.c.bf16 %v1095_v22, %v1094_v21  ;;  %v872_v32 = vld [vmem:[%s3286_s11 + $0x30] sm:$0xff]  ;;  %v2213_v34 = vpack.c.bf16 %v1113_v25, %v1112_v23  ;;  %v1114_v37 = vld [vmem:[%s3276_s18 + $0xc0] sm:$0xff]  ;;  %v2181_v38 = vpack.c.bf16 %v889_v27, %v888_v26 }
 0x12f   : > { %v873_v33 = vld [vmem:[%s3286_s11 + $0x38] sm:$0xff]  ;;  %v1096_v35 = vld [vmem:[%s3276_s18 + $0x30] sm:$0xff]  ;;  %2178 = vmatprep.subr.bf16.mxu1 %v2177_v24  ;;  %v891_v41 = vld [vmem:[%s3286_s11 + $0xc8] sm:$0xff] }
 0x130   : > { %v1097_v36 = vld [vmem:[%s3276_s18 + $0x38] sm:$0xff]  ;;  %v2183_v42 = vpack.c.bf16 %v873_v33, %v872_v32  ;;  %v620_v43 = vld [vmem:[%s3214_s21 + $0x30] sm:$0xff]  ;;  %v623_v47 = vld [vmem:[%s3214_s21 + $0x48] sm:$0xff] }
 0x131   : > { %2160 = vmatpush3.bf16.msra.mxu0 %v2159_v39  ;;  %v1115_v39 = vld [vmem:[%s3276_s18 + $0xc8] sm:$0xff]  ;;  %v2215_v44 = vpack.c.bf16 %v1097_v36, %v1096_v35  ;;  %v1098_v49 = vld [vmem:[%s3276_s18 + $0x40] sm:$0xff]  ;;  %v1117_v53 = vld [vmem:[%s3276_s18 + $0xd8] sm:$0xff] }
 0x132   : > { %2162 = vmatprep.subr.bf16.mxu0 %v2161_v40  ;;  %v890_v40 = vld [vmem:[%s3286_s11 + $0xc0] sm:$0xff]  ;;  %2180 = vmatpush3.bf16.msra.mxu1 %v2179_v29  ;;  %v2217_v48 = vpack.c.bf16 %v1115_v39, %v1114_v37  ;;  %v1099_v50 = vld [vmem:[%s3276_s18 + $0x48] sm:$0xff]  ;;  %v625_v57 = vld [vmem:[%s3214_s21 + $0x58] sm:$0xff] }
 0x133   : > { %2182 = vmatprep.subr.bf16.mxu1 %v2181_v38  ;;  %v2219_v56 = vpack.c.bf16 %v1099_v50, %v1098_v49  ;;  %v1101_v60 = vld [vmem:[%s3276_s18 + $0x58] sm:$0xff]  ;;  %v1118_v61 = vld [vmem:[%s3276_s18 + $0xe0] sm:$0xff]  ;;  %v1119_v62 = vld [vmem:[%s3276_s18 + $0xe8] sm:$0xff] }
 0x134   : > { %v624_v63 = vld [vmem:[%s3214_s21 + $0x50] sm:$0xff]  ;;  %v627_v1 = vld [vmem:[%s3214_s21 + $0x68] sm:$0xff]  ;;  %v2225_v2 = vpack.c.bf16 %v1119_v62, %v1118_v61  ;;  %v1120_v5 = vld [vmem:[%s3276_s18 + $0xf0] sm:$0xff] }
 0x135   : > { %2164 = vmatpush3.bf16.msra.mxu0 %v2163_v45  ;;  %v874_v45 = vld [vmem:[%s3286_s11 + $0x40] sm:$0xff]  ;;  %v1103_v4 = vld [vmem:[%s3276_s18 + $0x68] sm:$0xff]  ;;  %v626_v7 = vld [vmem:[%s3214_s21 + $0x60] sm:$0xff] }
 0x136   : > { %2166 = vmatprep.subr.bf16.mxu0 %v2165_v46  ;;  %v875_v46 = vld [vmem:[%s3286_s11 + $0x48] sm:$0xff]  ;;  %2184 = vmatpush3.bf16.msra.mxu1 %v2183_v42  ;;  %v1102_v3 = vld [vmem:[%s3276_s18 + $0x60] sm:$0xff]  ;;  %v629_v9 = vld [vmem:[%s3214_s21 + $0x78] sm:$0xff] }
 0x137   : > { %v2187_v54 = vpack.c.bf16 %v875_v46, %v874_v45  ;;  %v2227_v8 = vpack.c.bf16 %v1103_v4, %v1102_v3  ;;  %v1104_v11 = vld [vmem:[%s3276_s18 + $0x70] sm:$0xff]  ;;  %v1105_v12 = vld [vmem:[%s3276_s18 + $0x78] sm:$0xff]  ;;  %v628_v13 = vld [vmem:[%s3214_s21 + $0x70] sm:$0xff] }
 0x138   : > { %v631_v15 = vld [vmem:[%s3214_s21 + $0x88] sm:$0xff]  ;;  %v632_v18 = vld [vmem:[%s3214_s21 + $0x90] sm:$0xff]  ;;  %v637_v21 = vld [vmem:[%s3214_s21 + $0xb8] sm:$0xff] }
 0x139   : > { %2168 = vmatpush3.bf16.msra.mxu0 %v2167_v51  ;;  %v2185_v51 = vpack.c.bf16 %v891_v41, %v890_v40  ;;  %v635_v19 = vld [vmem:[%s3214_s21 + $0xa8] sm:$0xff]  ;;  %v636_v22 = vld [vmem:[%s3214_s21 + $0xb0] sm:$0xff]  ;;  %v638_v24 = vld [vmem:[%s3214_s21 + $0xc0] sm:$0xff] }
 0x13a   : > { %2202 = vmatprep.subr.bf16.mxu0 %v2201_v52  ;;  %v1116_v52 = vld [vmem:[%s3276_s18 + $0xd0] sm:$0xff]  ;;  %v639_v23 = vld [vmem:[%s3214_s21 + $0xc8] sm:$0xff]  ;;  %v640_v26 = vld [vmem:[%s3214_s21 + $0xd0] sm:$0xff] }
 0x13b   : > { %v2221_v58 = vpack.c.bf16 %v1117_v53, %v1116_v52  ;;  %2186 = vmatprep.subr.bf16.mxu1 %v2185_v51  ;;  %v641_v25 = vld [vmem:[%s3214_s21 + $0xd8] sm:$0xff]  ;;  %v643_v27 = vld [vmem:[%s3214_s21 + $0xe8] sm:$0xff]  ;;  %v1086_v32 = vld [vmem:[%s3206_s20] sm:$0xff] }
 0x13c   : > { %753 = vmatmul.mubr.f32.vlgmr.msra.gmra.mrb[0].mxu0 %v614_v55  ;;  %v622_v55 = vld [vmem:[%s3214_s21 + $0x40] sm:$0xff]  ;;  %2188 = vmatpush3.bf16.msra.mxu1 %v2187_v54  ;;  %v645_v29 = vld [vmem:[%s3214_s21 + $0xf8] sm:$0xff]  ;;  %v894_v39 = vld [vmem:[%s3286_s11 + $0xe0] sm:$0xff] }
 0x13d   : > { %757 = vmatprep.mubr.f32.mxu0 %v617_v59  ;;  %2204 = vmatpush3.bf16.msra.mxu0 %v2203_v0  ;;  %v1100_v59 = vld [vmem:[%s3276_s18 + $0x50] sm:$0xff]  ;;  %v877_v37 = vld [vmem:[%s3286_s11 + $0x58] sm:$0xff]  ;;  %v895_v40 = vld [vmem:[%s3286_s11 + $0xe8] sm:$0xff] }
 0x13e   : > { %2206 = vmatprep.subr.bf16.mxu0 %v2205_v6  ;;  %v2223_v0 = vpack.c.bf16 %v1101_v60, %v1100_v59  ;;  %v1121_v6 = vld [vmem:[%s3276_s18 + $0xf8] sm:$0xff]  ;;  %v892_v33 = vld [vmem:[%s3286_s11 + $0xd0] sm:$0xff]  ;;  %v2193_v41 = vpack.c.bf16 %v895_v40, %v894_v39  ;;  %v878_v42 = vld [vmem:[%s3286_s11 + $0x60] sm:$0xff] }
 0x13f   : > { %v2229_v10 = vpack.c.bf16 %v1121_v6, %v1120_v5  ;;  %v876_v36 = vld [vmem:[%s3286_s11 + $0x50] sm:$0xff]  ;;  %v897_v46 = vld [vmem:[%s3286_s11 + $0xf8] sm:$0xff]  ;;  %v834_v51 = vld [vmem:[%s3220_s12 + $0x8] sm:$0xff] }
 0x140   : > { %758 = vmatmul.mubr.f32.gmra.mrb[2].mxu0 %v616_v14  ;;  %v2231_v14 = vpack.c.bf16 %v1105_v12, %v1104_v11  ;;  %v2191_v38 = vpack.c.bf16 %v877_v37, %v876_v36  ;;  %v896_v45 = vld [vmem:[%s3286_s11 + $0xf0] sm:$0xff]  ;;  %v881_v49 = vld [vmem:[%s3286_s11 + $0x78] sm:$0xff]  ;;  %970 = vmatprep.mubr.f32.mxu1 %v834_v51  ;;  %v835_v54 = vld [vmem:[%s3220_s12 + $0x10] sm:$0xff] }
 0x141   : > { %762 = vmatprep.mubr.f32.mxu0 %v619_v16  ;;  %2208 = vmatpush3.bf16.msra.mxu0 %v2207_v17  ;;  %v630_v16 = vld [vmem:[%s3214_s21 + $0x80] sm:$0xff]  ;;  %v633_v17 = vld [vmem:[%s3214_s21 + $0x98] sm:$0xff]  ;;  %v839_v59 = vld [vmem:[%s3220_s12 + $0x30] sm:$0xff] }
 0x142   : > { %2210 = vmatprep.subr.bf16.mxu0 %v2209_v20  ;;  %v634_v20 = vld [vmem:[%s3214_s21 + $0xa0] sm:$0xff]  ;;  %v836_v53 = vld [vmem:[%s3220_s12 + $0x18] sm:$0xff]  ;;  %v842_v60 = vld [vmem:[%s3220_s12 + $0x48] sm:$0xff] }
 0x143   : > { %v833_v52 = vld [vmem:[%s3220_s12] sm:$0xff]  ;;  %v844_v62 = vld [vmem:[%s3220_s12 + $0x58] sm:$0xff]  ;;  %v847_v3 = vld [vmem:[%s3220_s12 + $0x70] sm:$0xff] }
 0x144   : > { %763 = vmatmul.mubr.f32.gmra.mrb[4].mxu0 %v618_v28  ;;  %v642_v28 = vld [vmem:[%s3214_s21 + $0xe0] sm:$0xff]  ;;  %v850_v4 = vld [vmem:[%s3220_s12 + $0x88] sm:$0xff]  ;;  %v852_v6 = vld [vmem:[%s3220_s12 + $0x98] sm:$0xff] }
 0x145   : > { %767 = vmatprep.mubr.f32.mxu0 %v621_v30  ;;  %2212 = vmatpush3.bf16.msra.mxu0 %v2211_v31  ;;  %v644_v30 = vld [vmem:[%s3214_s21 + $0xf0] sm:$0xff]  ;;  %v1087_v31 = vld [vmem:[%s3206_s20 + $0x8] sm:$0xff]  ;;  %v841_v61 = vld [vmem:[%s3220_s12 + $0x40] sm:$0xff] }
 0x146   : > { %2214 = vmatprep.subr.bf16.mxu0 %v2213_v34  ;;  %v893_v34 = vld [vmem:[%s3286_s11 + $0xd8] sm:$0xff]  ;;  %v855_v11 = vld [vmem:[%s3220_s12 + $0xb0] sm:$0xff]  ;;  %v858_v12 = vld [vmem:[%s3220_s12 + $0xc8] sm:$0xff] }
 0x147   : > { %v2189_v35 = vpack.c.bf16 %v893_v34, %v892_v33  ;;  %v849_v5 = vld [vmem:[%s3220_s12 + $0x80] sm:$0xff] }
 0x148   : > { %768 = vmatmul.mubr.f32.gmra.mrb[6].mxu0 %v620_v43  ;;  %v879_v43 = vld [vmem:[%s3286_s11 + $0x68] sm:$0xff] }
 0x149   : > { %772 = vmatprep.mubr.f32.mxu0 %v623_v47  ;;  %2216 = vmatpush3.bf16.msra.mxu0 %v2215_v44  ;;  %v2195_v44 = vpack.c.bf16 %v879_v43, %v878_v42  ;;  %v2197_v47 = vpack.c.bf16 %v897_v46, %v896_v45 }
 0x14a   : > { %2218 = vmatprep.subr.bf16.mxu0 %v2217_v48  ;;  %2190 = vmatprep.subr.bf16.mxu1 %v2189_v35  ;;  %v880_v48 = vld [vmem:[%s3286_s11 + $0x70] sm:$0xff] }
 0x14b   : > { %2192 = vmatpush3.bf16.msra.mxu1 %v2191_v38  ;;  %v2199_v50 = vpack.c.bf16 %v881_v49, %v880_v48 }
 0x14c   : > { %773 = vmatmul.mubr.f32.gmra.mrb[8].mxu0 %v622_v55  ;;  %2194 = vmatprep.subr.bf16.mxu1 %v2193_v41  ;;  %v2817_v55 = vmov 0.0|0.0  }
 0x14d   : > { %777 = vmatprep.mubr.f32.mxu0 %v625_v57  ;;  %2220 = vmatpush3.bf16.msra.mxu0 %v2219_v56  ;;  %v838_v56 = vld [vmem:[%s3220_s12 + $0x28] sm:$0xff]  ;;  %v837_v57 = vld [vmem:[%s3220_s12 + $0x20] sm:$0xff] }
 0x14e   : > { %2222 = vmatprep.subr.bf16.mxu0 %v2221_v58  ;;  %v840_v58 = vld [vmem:[%s3220_s12 + $0x38] sm:$0xff] }
 0x14f   : > { %2196 = vmatpush3.bf16.msra.mxu1 %v2195_v44 }
 0x150   : > { %778 = vmatmul.mubr.f32.gmra.mrb[10].mxu0 %v624_v63  ;;  %2198 = vmatprep.subr.bf16.mxu1 %v2197_v47  ;;  %v843_v63 = vld [vmem:[%s3220_s12 + $0x50] sm:$0xff] }
 0x151   : > { %782 = vmatprep.mubr.f32.mxu0 %v627_v1  ;;  %2224 = vmatpush3.bf16.msra.mxu0 %v2223_v0  ;;  %v846_v0 = vld [vmem:[%s3220_s12 + $0x68] sm:$0xff]  ;;  %v845_v1 = vld [vmem:[%s3220_s12 + $0x60] sm:$0xff] }
 0x152   : > { %2226 = vmatprep.subr.bf16.mxu0 %v2225_v2  ;;  %v848_v2 = vld [vmem:[%s3220_s12 + $0x78] sm:$0xff] }
 0x153   : > { %2200 = vmatpush3.bf16.msra.mxu1 %v2199_v50 }
 0x154   : > { %783 = vmatmul.mubr.f32.gmra.mrb[12].mxu0 %v626_v7  ;;  %2233 = vmatprep.subr.bf16.mxu1 %v2817_v55  ;;  %v851_v7 = vld [vmem:[%s3220_s12 + $0x90] sm:$0xff] }
 0x155   : > { %787 = vmatprep.mubr.f32.mxu0 %v629_v9  ;;  %2228 = vmatpush3.bf16.msra.mxu0 %v2227_v8  ;;  %v854_v8 = vld [vmem:[%s3220_s12 + $0xa8] sm:$0xff]  ;;  %v853_v9 = vld [vmem:[%s3220_s12 + $0xa0] sm:$0xff] }
 0x156   : > { %2230 = vmatprep.subr.bf16.mxu0 %v2229_v10  ;;  %971 = vmatmul.mubr.f32.vlgmr.msra.gmra.mrb[0].mxu1 %v833_v52  ;;  %v856_v10 = vld [vmem:[%s3220_s12 + $0xb8] sm:$0xff] }
 0x157   : > { %975 = vmatprep.mubr.f32.mxu1 %v836_v53 }
 0x158   : > { %788 = vmatmul.mubr.f32.gmra.mrb[14].mxu0 %v628_v13  ;;  %v857_v13 = vld [vmem:[%s3220_s12 + $0xc0] sm:$0xff] }
 0x159   : > { %792 = vmatprep.mubr.f32.mxu0 %v631_v15  ;;  %2232 = vmatpush3.bf16.msra.mxu0 %v2231_v14  ;;  %v860_v14 = vld [vmem:[%s3220_s12 + $0xd8] sm:$0xff]  ;;  %v859_v15 = vld [vmem:[%s3220_s12 + $0xd0] sm:$0xff] }
 0x15a   : > { %976 = vmatmul.mubr.f32.gmra.mrb[2].mxu1 %v835_v54  ;;  %2257 = vmatprep.subr.bf16.mxu0 %v2817_v55 }
 0x15b   : > { %980 = vmatprep.mubr.f32.mxu1 %v838_v56 }
 0x15c   : > { %793 = vmatmul.mubr.f32.gmra.mrb[16].mxu0 %v630_v16  ;;  %v862_v16 = vld [vmem:[%s3220_s12 + $0xe8] sm:$0xff] }
 0x15d   : > { %797 = vmatprep.mubr.f32.mxu0 %v633_v17  ;;  %v861_v17 = vld [vmem:[%s3220_s12 + $0xe0] sm:$0xff] }
 0x15e   : > { %981 = vmatmul.mubr.f32.gmra.mrb[4].mxu1 %v837_v57 }
 0x15f   : > { %985 = vmatprep.mubr.f32.mxu1 %v840_v58 }
 0x160   : > { %798 = vmatmul.mubr.f32.gmra.mrb[18].mxu0 %v632_v18  ;;  %v864_v18 = vld [vmem:[%s3220_s12 + $0xf8] sm:$0xff] }
 0x161   : > { %802 = vmatprep.mubr.f32.mxu0 %v635_v19  ;;  %v863_v19 = vld [vmem:[%s3220_s12 + $0xf0] sm:$0xff] }
 0x162   : > { %986 = vmatmul.mubr.f32.gmra.mrb[6].mxu1 %v839_v59 }
 0x163   : > { %990 = vmatprep.mubr.f32.mxu1 %v842_v60 }
 0x164   : > { %803 = vmatmul.mubr.f32.gmra.mrb[20].mxu0 %v634_v20  ;;  %v2819_v20 = vmov 0.0  }
 0x165   : > { %807 = vmatprep.mubr.f32.mxu0 %v637_v21 }
 0x166   : > { %991 = vmatmul.mubr.f32.gmra.mrb[8].mxu1 %v841_v61 }
 0x167   : > { %995 = vmatprep.mubr.f32.mxu1 %v844_v62 }
 0x168   : > { %808 = vmatmul.mubr.f32.gmra.mrb[22].mxu0 %v636_v22  ;;  %v3418_v22 = vld [vmem:[%s680_s9] ss:$0 sm:$0xff] }
 0x169   : > { %812 = vmatprep.mubr.f32.mxu0 %v639_v23 }
 0x16a   : > { %996 = vmatmul.mubr.f32.gmra.mrb[10].mxu1 %v843_v63 }
 0x16b   : > { %1000 = vmatprep.mubr.f32.mxu1 %v846_v0 }
 0x16c   : > { %813 = vmatmul.mubr.f32.gmra.mrb[24].mxu0 %v638_v24 }
 0x16d   : > { %817 = vmatprep.mubr.f32.mxu0 %v641_v25 }
 0x16e   : > { %1001 = vmatmul.mubr.f32.gmra.mrb[12].mxu1 %v845_v1 }
 0x16f   : > { %1005 = vmatprep.mubr.f32.mxu1 %v848_v2 }
 0x170   : > { %818 = vmatmul.mubr.f32.gmra.mrb[26].mxu0 %v640_v26 }
 0x171   : > { %822 = vmatprep.mubr.f32.mxu0 %v643_v27 }
 0x172   : > { %1006 = vmatmul.mubr.f32.gmra.mrb[14].mxu1 %v847_v3 }
 0x173   : > { %1010 = vmatprep.mubr.f32.mxu1 %v850_v4 }
 0x174   : > { %823 = vmatmul.mubr.f32.gmra.mrb[28].mxu0 %v642_v28 }
 0x175   : > { %827 = vmatprep.mubr.f32.mxu0 %v645_v29 }
 0x176   : > { %1011 = vmatmul.mubr.f32.gmra.mrb[16].mxu1 %v849_v5 }
 0x177   : > { %1015 = vmatprep.mubr.f32.mxu1 %v852_v6 }
 0x178   : > { %828 = vmatmul.mubr.f32.gmra.mrb[30].mxu0 %v644_v30 }
 0x179   : > { %1194 = vmatprep.mubr.f32.mxu0 %v1087_v31 }
 0x17a   : > { %1016 = vmatmul.mubr.f32.gmra.mrb[18].mxu1 %v851_v7 }
 0x17b   : > { %1020 = vmatprep.mubr.f32.mxu1 %v854_v8 }
 0x17c   : > { %1195 = vmatmul.mubr.f32.vlgmr.msra.gmra.mrb[32].mxu0 %v1086_v32 }
 0x17d   : > { %2134 = vmatprep.mubr.msk.f32.mxu0 %vm2818_vm0, %v2819_v20 }
 0x17e   : > { %1021 = vmatmul.mubr.f32.gmra.mrb[20].mxu1 %v853_v9 }
 0x17f   : > { %1025 = vmatprep.mubr.f32.mxu1 %v856_v10 }
 0x182   : > { %1026 = vmatmul.mubr.f32.gmra.mrb[22].mxu1 %v855_v11 }
 0x183   : > { %1030 = vmatprep.mubr.f32.mxu1 %v858_v12 }
 0x186   : > { %1031 = vmatmul.mubr.f32.gmra.mrb[24].mxu1 %v857_v13 }
 0x187   : > { %1035 = vmatprep.mubr.f32.mxu1 %v860_v14 }
 0x18a   : > { %1036 = vmatmul.mubr.f32.gmra.mrb[26].mxu1 %v859_v15 }
 0x18b   : > { %1040 = vmatprep.mubr.f32.mxu1 %v862_v16 }
 0x18e   : > { %1041 = vmatmul.mubr.f32.gmra.mrb[28].mxu1 %v861_v17 }
 0x18f   : > { %1045 = vmatprep.mubr.f32.mxu1 %v864_v18 }
 0x192   : > { %1046 = vmatmul.mubr.f32.gmra.mrb[30].mxu1 %v863_v19 }
 0x193   : > { %2099 = vmatprep.mubr.msk.f32.mxu1 %vm2818_vm0, %v2819_v20 }
 0x20f   : > { %v1870_v21 = vpop.f32.mrb[0].mxu0 }
 0x210   : > { %v1871_v23 = vpop.f32.mrb[1].mxu0 }
 0x211   : > { %v1872_v24 = vadd.f32 %v1871_v23, %v1870_v21 }
 0x213   : > { %v755_v25 = vadd.f32 %v1872_v24, %v3418_v22  ;;  %v1873_v26 = vpop.f32.mrb[2].mxu0 }
 0x214   : > { %v1874_v27 = vpop.f32.mrb[3].mxu0 }
 0x215   : > { %v1875_v28 = vadd.f32 %v1874_v27, %v1873_v26 }
 0x217   : > { %v760_v29 = vadd.f32 %v1875_v28, %v3418_v22  ;;  %v1876_v30 = vpop.f32.mrb[4].mxu0 }
 0x218   : > { %v1877_v31 = vpop.f32.mrb[5].mxu0 }
 0x219   : > { %v1878_v32 = vadd.f32 %v1877_v31, %v1876_v30  ;;  %v2234_v33 = vpack.c.bf16 %v760_v29, %v755_v25 }
 0x21b   : > { %v765_v34 = vadd.f32 %v1878_v32, %v3418_v22  ;;  %v1879_v35 = vpop.f32.mrb[6].mxu0  ;;  %2235 = vmatpush3.bf16.xpose.msra.mxu1 %v2234_v33  ;;  %v1821_v33 = vld [vmem:[%s1122_s24] ss:$0 sm:$0xff] }
 0x21c   : > { %v1880_v36 = vpop.f32.mrb[7].mxu0  ;;  %2236 = vmatprep.subr.bf16.mxu1 %v2817_v55 }
 0x21d   : > { %v1881_v37 = vadd.f32 %v1880_v36, %v1879_v35 }
 0x21f   : > { %v770_v38 = vadd.f32 %v1881_v37, %v3418_v22  ;;  %v1882_v39 = vpop.f32.mrb[8].mxu0 }
 0x220   : > { %v1883_v40 = vpop.f32.mrb[9].mxu0 }
 0x221   : > { %v1884_v41 = vadd.f32 %v1883_v40, %v1882_v39  ;;  %v2237_v42 = vpack.c.bf16 %v770_v38, %v765_v34  ;;  %v3452_v40 = vld [vmem:[%s898_s15] ss:$0 sm:$0xff] }
 0x223   : > { %v775_v43 = vadd.f32 %v1884_v41, %v3418_v22  ;;  %v1885_v44 = vpop.f32.mrb[10].mxu0  ;;  %2238 = vmatpush3.bf16.xpose.msra.mxu1 %v2237_v42 }
 0x224   : > { %v1886_v45 = vpop.f32.mrb[11].mxu0  ;;  %2239 = vmatprep.subr.bf16.mxu1 %v2817_v55 }
 0x225   : > { %v1887_v46 = vadd.f32 %v1886_v45, %v1885_v44 }
 0x227   : > { %v780_v47 = vadd.f32 %v1887_v46, %v3418_v22  ;;  %v1888_v48 = vpop.f32.mrb[12].mxu0 }
 0x228   : > { %v1889_v49 = vpop.f32.mrb[13].mxu0 }
 0x229   : > { %v1890_v50 = vadd.f32 %v1889_v49, %v1888_v48  ;;  %v2240_v51 = vpack.c.bf16 %v780_v47, %v775_v43  ;;  %v1950_v39 = vpop.f32.mrb[0].mxu1 }
 0x22a   : > { %v1951_v41 = vpop.f32.mrb[1].mxu1 }
 0x22b   : > { %v785_v52 = vadd.f32 %v1890_v50, %v3418_v22  ;;  %v1891_v53 = vpop.f32.mrb[14].mxu0  ;;  %2241 = vmatpush3.bf16.xpose.msra.mxu1 %v2240_v51 }
 0x22c   : > { %v1892_v54 = vpop.f32.mrb[15].mxu0  ;;  %2242 = vmatprep.subr.bf16.mxu1 %v2817_v55 }
 0x22d   : > { %v1893_v56 = vadd.f32 %v1892_v54, %v1891_v53  ;;  %v1953_v43 = vpop.f32.mrb[2].mxu1 }
 0x22e   : > { %v1954_v44 = vpop.f32.mrb[3].mxu1 }
 0x22f   : > { %v790_v57 = vadd.f32 %v1893_v56, %v3418_v22  ;;  %v1894_v58 = vpop.f32.mrb[16].mxu0  ;;  %v1955_v45 = vadd.f32 %v1954_v44, %v1953_v43 }
 0x230   : > { %v1895_v59 = vpop.f32.mrb[17].mxu0 }
 0x231   : > { %v1896_v60 = vadd.f32 %v1895_v59, %v1894_v58  ;;  %v2243_v61 = vpack.c.bf16 %v790_v57, %v785_v52  ;;  %v978_v46 = vadd.f32 %v1955_v45, %v3452_v40  ;;  %v1956_v47 = vpop.f32.mrb[4].mxu1 }
 0x232   : > { %v1957_v48 = vpop.f32.mrb[5].mxu1 }
 0x233   : > { %v795_v62 = vadd.f32 %v1896_v60, %v3418_v22  ;;  %v1897_v63 = vpop.f32.mrb[18].mxu0  ;;  %2244 = vmatpush3.bf16.xpose.msra.mxu1 %v2243_v61  ;;  %v1958_v49 = vadd.f32 %v1957_v48, %v1956_v47 }
 0x234   : > { %v1898_v0 = vpop.f32.mrb[19].mxu0  ;;  %2245 = vmatprep.subr.bf16.mxu1 %v2817_v55 }
 0x235   : > { %v1899_v1 = vadd.f32 %v1898_v0, %v1897_v63  ;;  %v983_v50 = vadd.f32 %v1958_v49, %v3452_v40  ;;  %v1959_v51 = vpop.f32.mrb[6].mxu1  ;;  %v1289_v49 = vlaneseq }
 0x236   : > { %v1960_v52 = vpop.f32.mrb[7].mxu1 }
 0x237   : > { %v800_v2 = vadd.f32 %v1899_v1, %v3418_v22  ;;  %v1900_v3 = vpop.f32.mrb[20].mxu0  ;;  %v1961_v53 = vadd.f32 %v1960_v52, %v1959_v51 }
 0x238   : > { %v1901_v4 = vpop.f32.mrb[21].mxu0 }
 0x239   : > { %v1902_v5 = vadd.f32 %v1901_v4, %v1900_v3  ;;  %v2246_v6 = vpack.c.bf16 %v800_v2, %v795_v62  ;;  %v988_v54 = vadd.f32 %v1961_v53, %v3452_v40  ;;  %v1962_v56 = vpop.f32.mrb[8].mxu1 }
 0x23a   : > { %v1963_v57 = vpop.f32.mrb[9].mxu1 }
 0x23b   : > { %v805_v7 = vadd.f32 %v1902_v5, %v3418_v22  ;;  %v1903_v8 = vpop.f32.mrb[22].mxu0  ;;  %2247 = vmatpush3.bf16.xpose.msra.mxu1 %v2246_v6  ;;  %v1964_v58 = vadd.f32 %v1963_v57, %v1962_v56  ;;  %v2261_v59 = vpack.c.bf16 %v988_v54, %v983_v50 }
 0x23c   : > { %v1904_v9 = vpop.f32.mrb[23].mxu0  ;;  %2248 = vmatprep.subr.bf16.mxu1 %v2817_v55 }
 0x23d   : > { %v1905_v10 = vadd.f32 %v1904_v9, %v1903_v8  ;;  %v993_v60 = vadd.f32 %v1964_v58, %v3452_v40  ;;  %v1965_v61 = vpop.f32.mrb[10].mxu1  ;;  %v1394_v58 = vld [vmem:[%s3482_s19] sm:$0xff] }
 0x23e   : > { %v1966_v62 = vpop.f32.mrb[11].mxu1 }
 0x23f   : > { %v810_v11 = vadd.f32 %v1905_v10, %v3418_v22  ;;  %v1906_v12 = vpop.f32.mrb[24].mxu0  ;;  %v1967_v63 = vadd.f32 %v1966_v62, %v1965_v61  ;;  %v1399_v61 = vld [vmem:[%s3482_s19 + $0x28] sm:$0xff]  ;;  %v1401_v62 = vld [vmem:[%s3482_s19 + $0x38] sm:$0xff] }
 0x240   : > { %v1907_v13 = vpop.f32.mrb[25].mxu0 }
 0x241   : > { %v1908_v14 = vadd.f32 %v1907_v13, %v1906_v12  ;;  %v2249_v15 = vpack.c.bf16 %v810_v11, %v805_v7  ;;  %v998_v0 = vadd.f32 %v1967_v63, %v3452_v40  ;;  %v1968_v1 = vpop.f32.mrb[12].mxu1 }
 0x242   : > { %v1969_v2 = vpop.f32.mrb[13].mxu1 }
 0x243   : > { %v815_v16 = vadd.f32 %v1908_v14, %v3418_v22  ;;  %v1909_v17 = vpop.f32.mrb[26].mxu0  ;;  %2250 = vmatpush3.bf16.xpose.msra.mxu1 %v2249_v15  ;;  %v1970_v3 = vadd.f32 %v1969_v2, %v1968_v1  ;;  %v2264_v4 = vpack.c.bf16 %v998_v0, %v993_v60  ;;  %v1396_v60 = vld [vmem:[%s3482_s19 + $0x10] sm:$0xff]  ;;  %v2285_v0 = vpack.c.bf16 %v1401_v62, %v1399_v61  ;;  %v1398_v1 = vld [vmem:[%s3482_s19 + $0x20] sm:$0xff] }
 0x244   : > { %v1910_v18 = vpop.f32.mrb[27].mxu0  ;;  %2251 = vmatprep.subr.bf16.mxu1 %v2817_v55  ;;  %v2283_v63 = vpack.c.bf16 %v1396_v60, %v1394_v58  ;;  %v1400_v2 = vld [vmem:[%s3482_s19 + $0x30] sm:$0xff] }
 0x245   : > { %v1911_v19 = vadd.f32 %v1910_v18, %v1909_v17  ;;  %v1003_v5 = vadd.f32 %v1970_v3, %v3452_v40  ;;  %v1971_v6 = vpop.f32.mrb[14].mxu1  ;;  %v1403_v3 = vld [vmem:[%s3482_s19 + $0x48] sm:$0xff] }
 0x246   : > { %v1972_v7 = vpop.f32.mrb[15].mxu1 }
 0x247   : > { %v820_v21 = vadd.f32 %v1911_v19, %v3418_v22  ;;  %v1912_v23 = vpop.f32.mrb[28].mxu0  ;;  %v1973_v8 = vadd.f32 %v1972_v7, %v1971_v6  ;;  %v1402_v7 = vld [vmem:[%s3482_s19 + $0x40] sm:$0xff] }
 0x248   : > { %v1913_v24 = vpop.f32.mrb[29].mxu0 }
 0x249   : > { %v1914_v25 = vadd.f32 %v1913_v24, %v1912_v23  ;;  %v2252_v26 = vpack.c.bf16 %v820_v21, %v815_v16  ;;  %v1008_v9 = vadd.f32 %v1973_v8, %v3452_v40  ;;  %v1974_v10 = vpop.f32.mrb[16].mxu1  ;;  %v1404_v8 = vld [vmem:[%s3482_s19 + $0x50] sm:$0xff] }
 0x24a   : > { %v1975_v11 = vpop.f32.mrb[17].mxu1 }
 0x24b   : > { %v825_v27 = vadd.f32 %v1914_v25, %v3418_v22  ;;  %v1915_v28 = vpop.f32.mrb[30].mxu0  ;;  %2253 = vmatpush3.bf16.xpose.msra.mxu1 %v2252_v26  ;;  %v1976_v12 = vadd.f32 %v1975_v11, %v1974_v10  ;;  %v2267_v13 = vpack.c.bf16 %v1008_v9, %v1003_v5  ;;  %v2287_v5 = vpack.c.bf16 %v1400_v2, %v1398_v1  ;;  %v1407_v9 = vld [vmem:[%s3482_s19 + $0x68] sm:$0xff]  ;;  %v1409_v10 = vld [vmem:[%s3482_s19 + $0x78] sm:$0xff] }
 0x24c   : > { %v1916_v29 = vpop.f32.mrb[31].mxu0  ;;  %2254 = vmatprep.subr.bf16.mxu1 %v2817_v55  ;;  %v2291_v11 = vpack.c.bf16 %v1404_v8, %v1402_v7 }
 0x24d   : > { %v1917_v30 = vadd.f32 %v1916_v29, %v1915_v28  ;;  %v1013_v14 = vadd.f32 %v1976_v12, %v3452_v40  ;;  %v1977_v15 = vpop.f32.mrb[18].mxu1  ;;  %v2293_v12 = vpack.c.bf16 %v1409_v10, %v1407_v9 }
 0x24e   : > { %v1978_v16 = vpop.f32.mrb[19].mxu1 }
 0x24f   : > { %v830_v31 = vadd.f32 %v1917_v30, %v3418_v22  ;;  %v2030_v32 = vpop.f32.mrb[32].mxu0  ;;  %v1952_v22 = vadd.f32 %v1951_v41, %v1950_v39  ;;  %v1979_v17 = vadd.f32 %v1978_v16, %v1977_v15  ;;  %v1411_v15 = vld [vmem:[%s3482_s19 + $0x88] sm:$0xff]  ;;  %v1413_v16 = vld [vmem:[%s3482_s19 + $0x98] sm:$0xff] }
 0x250   : > { %v2031_v34 = vpop.f32.mrb[33].mxu0 }
 0x251   : > { %v2032_v35 = vadd.f32 %v2031_v34, %v2030_v32  ;;  %v2255_v36 = vpack.c.bf16 %v830_v31, %v825_v27  ;;  %v973_v42 = vadd.f32 %v1952_v22, %v3452_v40  ;;  %v1018_v18 = vadd.f32 %v1979_v17, %v3452_v40  ;;  %v1980_v19 = vpop.f32.mrb[20].mxu1 }
 0x252   : > { %v1981_v21 = vpop.f32.mrb[21].mxu1 }
 0x253   : > { %v1197_v37 = vadd.f32 %v2032_v35, %v1821_v33  ;;  %2256 = vmatpush3.bf16.xpose.msra.mxu1 %v2255_v36  ;;  %v1982_v23 = vadd.f32 %v1981_v21, %v1980_v19  ;;  %v2270_v24 = vpack.c.bf16 %v1018_v18, %v1013_v14  ;;  %v1408_v14 = vld [vmem:[%s3482_s19 + $0x70] sm:$0xff]  ;;  %v2297_v18 = vpack.c.bf16 %v1413_v16, %v1411_v15  ;;  %v1410_v19 = vld [vmem:[%s3482_s19 + $0x80] sm:$0xff] }
 0x254   : > { %v1412_v21 = vld [vmem:[%s3482_s19 + $0x90] sm:$0xff] }
 0x255   : > { %v1200_v38 = vmul.f32 0.088388346, %v1197_v37  ;;  %v1023_v25 = vadd.f32 %v1982_v23, %v3452_v40  ;;  %v1983_v26 = vpop.f32.mrb[22].mxu1  ;;  %v1415_v23 = vld [vmem:[%s3482_s19 + $0xa8] sm:$0xff] }
 0x256   : > { %v1984_v27 = vpop.f32.mrb[23].mxu1 }
 0x257   : > { %v1985_v28 = vadd.f32 %v1984_v27, %v1983_v26  ;;  %v1414_v27 = vld [vmem:[%s3482_s19 + $0xa0] sm:$0xff] }
 0x259   : > { %v1028_v29 = vadd.f32 %v1985_v28, %v3452_v40  ;;  %v1986_v30 = vpop.f32.mrb[24].mxu1  ;;  %v1416_v28 = vld [vmem:[%s3482_s19 + $0xb0] sm:$0xff] }
 0x25a   : > { %2100 = vmatmul.mubr.f32.vlgmr.msra.gmra.mrb[32].mxu1 %v1200_v38  ;;  %v1987_v31 = vpop.f32.mrb[25].mxu1 }
 0x25b   : > { %1490 = vmatprep.mubr.f32.mxu1 %v2819_v20  ;;  %v2258_v20 = vpack.c.bf16 %v978_v46, %v973_v42  ;;  %v1988_v32 = vadd.f32 %v1987_v31, %v1986_v30  ;;  %v2273_v33 = vpack.c.bf16 %v1028_v29, %v1023_v25  ;;  %v2299_v25 = vpack.c.bf16 %v1412_v21, %v1410_v19  ;;  %v1419_v29 = vld [vmem:[%s3482_s19 + $0xc8] sm:$0xff]  ;;  %v1421_v30 = vld [vmem:[%s3482_s19 + $0xd8] sm:$0xff] }
 0x25c   : > { %v2303_v31 = vpack.c.bf16 %v1416_v28, %v1414_v27 }
 0x25d   : > { %2259 = vmatpush3.bf16.msra.mxu0 %v2258_v20  ;;  %v1033_v34 = vadd.f32 %v1988_v32, %v3452_v40  ;;  %v1989_v35 = vpop.f32.mrb[26].mxu1  ;;  %v1290_v20 = vand.u32 127, %v1289_v49  ;;  %v2305_v32 = vpack.c.bf16 %v1421_v30, %v1419_v29 }
 0x25e   : > { %2260 = vmatprep.subr.bf16.mxu0 %v2817_v55  ;;  %v1990_v36 = vpop.f32.mrb[27].mxu1 }
 0x25f   : > { %v1991_v37 = vadd.f32 %v1990_v36, %v1989_v35  ;;  %vm1291_vm1 = vcmp.lt.s32.totalorder %v1290_v20, 8  ;;  %v1423_v35 = vld [vmem:[%s3482_s19 + $0xe8] sm:$0xff]  ;;  %v1425_v36 = vld [vmem:[%s3482_s19 + $0xf8] sm:$0xff]  ;;  %v1389_v20 = vld [vmem:[#allocation4] sm:$0xff] }
 0x261   : > { %2262 = vmatpush3.bf16.msra.mxu0 %v2261_v59  ;;  %v1038_v38 = vadd.f32 %v1991_v37, %v3452_v40  ;;  %v1992_v39 = vpop.f32.mrb[28].mxu1 }
 0x262   : > { %2263 = vmatprep.subr.bf16.mxu0 %v2817_v55  ;;  %v1993_v41 = vpop.f32.mrb[29].mxu1 }
 0x263   : > { %v1994_v22 = vadd.f32 %v1993_v41, %v1992_v39  ;;  %v2276_v42 = vpack.c.bf16 %v1038_v38, %v1033_v34  ;;  %v1420_v34 = vld [vmem:[%s3482_s19 + $0xd0] sm:$0xff]  ;;  %v2309_v38 = vpack.c.bf16 %v1425_v36, %v1423_v35  ;;  %v1422_v39 = vld [vmem:[%s3482_s19 + $0xe0] sm:$0xff] }
 0x264   : > { %v1424_v41 = vld [vmem:[%s3482_s19 + $0xf0] sm:$0xff] }
 0x265   : > { %2265 = vmatpush3.bf16.msra.mxu0 %v2264_v4  ;;  %v1043_v43 = vadd.f32 %v1994_v22, %v3452_v40  ;;  %v1995_v44 = vpop.f32.mrb[30].mxu1  ;;  %v1405_v4 = vld [vmem:[%s3482_s19 + $0x58] sm:$0xff]  ;;  %v2311_v22 = vpack.c.bf16 %v1424_v41, %v1422_v39 }
 0x266   : > { %2266 = vmatprep.subr.bf16.mxu0 %v2817_v55  ;;  %v1996_v45 = vpop.f32.mrb[31].mxu1  ;;  %v2289_v6 = vpack.c.bf16 %v1405_v4, %v1403_v3 }
 0x267   : > { %v1997_v46 = vadd.f32 %v1996_v45, %v1995_v44  ;;  %v1501_v44 = vld [vmem:[#allocation5] sm:$0xff] }
 0x269   : > { %2268 = vmatpush3.bf16.msra.mxu0 %v2267_v13  ;;  %v1048_v47 = vadd.f32 %v1997_v46, %v3452_v40  ;;  %v1397_v40 = vld [vmem:[%s3482_s19 + $0x18] sm:$0xff]  ;;  %v1406_v13 = vld [vmem:[%s3482_s19 + $0x60] sm:$0xff] }
 0x26a   : > { %2269 = vmatprep.subr.bf16.mxu0 %v2817_v55  ;;  %v2295_v17 = vpack.c.bf16 %v1408_v14, %v1406_v13 }
 0x26b   : > { %v2279_v48 = vpack.c.bf16 %v1048_v47, %v1043_v43 }
 0x26d   : > { %2271 = vmatpush3.bf16.msra.mxu0 %v2270_v24  ;;  %v1417_v24 = vld [vmem:[%s3482_s19 + $0xb8] sm:$0xff] }
 0x26e   : > { %2272 = vmatprep.subr.bf16.mxu0 %v2817_v55  ;;  %v2301_v26 = vpack.c.bf16 %v1417_v24, %v1415_v23 }
 0x271   : > { %2274 = vmatpush3.bf16.msra.mxu0 %v2273_v33  ;;  %v1418_v33 = vld [vmem:[%s3482_s19 + $0xc0] sm:$0xff] }
 0x272   : > { %2275 = vmatprep.subr.bf16.mxu0 %v2817_v55  ;;  %v2307_v37 = vpack.c.bf16 %v1420_v34, %v1418_v33 }
 0x275   : > { %2277 = vmatpush3.bf16.msra.mxu0 %v2276_v42 }
 0x276   : > { %2278 = vmatprep.subr.bf16.mxu0 %v2817_v55  ;;  %v1395_v55 = vld [vmem:[%s3482_s19 + $0x8] sm:$0xff] }
 0x277   : > { %v2281_v59 = vpack.c.bf16 %v1397_v40, %v1395_v55 }
 0x279   : > { %2280 = vmatpush3.bf16.msra.mxu0 %v2279_v48  ;;  %2282 = vmatprep.subr.bf16.mxu1 %v2281_v59 }
 0x27a   : > { %2284 = vmatpush1.bf16.msra.mxu1 %v2283_v63 }
 0x27b   : > { %2286 = vmatprep.subr.bf16.mxu1 %v2285_v0 }
 0x27e   : > { %2288 = vmatpush1.bf16.msra.mxu1 %v2287_v5 }
 0x27f   : > { %2290 = vmatprep.subr.bf16.mxu1 %v2289_v6 }
 0x282   : > { %2292 = vmatpush1.bf16.msra.mxu1 %v2291_v11 }
 0x283   : > { %2294 = vmatprep.subr.bf16.mxu1 %v2293_v12 }
 0x286   : > { %2296 = vmatpush1.bf16.msra.mxu1 %v2295_v17 }
 0x287   : > { %2298 = vmatprep.subr.bf16.mxu1 %v2297_v18 }
 0x28a   : > { %2300 = vmatpush1.bf16.msra.mxu1 %v2299_v25 }
 0x28b   : > { %2302 = vmatprep.subr.bf16.mxu1 %v2301_v26 }
 0x28e   : > { %2304 = vmatpush1.bf16.msra.mxu1 %v2303_v31 }
 0x28f   : > { %2306 = vmatprep.subr.bf16.mxu1 %v2305_v32 }
 0x292   : > { %2308 = vmatpush1.bf16.msra.mxu1 %v2307_v37 }
 0x293   : > { %2310 = vmatprep.subr.bf16.mxu1 %v2309_v38 }
 0x296   : > { %2312 = vmatpush1.bf16.msra.mxu1 %v2311_v22 }
 0x32d   : > { %v1285_v50 = vpop.f32.mrb[32].mxu1 }
 0x32e   : > { %v2101_v51 = vpop.f32.mrb[33].mxu1  ;;  %v1292_v52 = vsel %vm1291_vm1, %v1285_v50, -1e+30  ;;  %v1390_v50 = vld [vmem:[#allocation4 + $0x8] sm:$0xff] }
 0x32f   : > { %1293 = vmax.xlane.f32.xlu0 %v1292_v52 }
 0x3bc   : > { %v1294_v53 = vpop.xlane.xlu0 %1293 }
 0x3bd   : > { %v1295_v54 = vsub.f32 %v1292_v52, %v1294_v53 }
 0x3bf   : > { %v1296_v56 = vmul.f32 1.442695, %v1295_v54 }
 0x3c1   : > { %2455 = vpow2.f32 %v1296_v56  ;;  %v1513_v56 = vshrl.u32 (!%p1825_p9), %v1289_v49, 7 }
 0x3c3   : > { %v1514_v40 = vsub.s32 (!%p1825_p9), 0, %v1513_v56  ;;  %v1518_v58 = vsub.s32 (!%p1825_p9), 1, %v1513_v56 }
 0x3cb   : > { %v3478_v57 = vpop.eup %2455 }
 0x3cc   : > { %1298 = vadd.xlane.f32.xlu0 %v3478_v57 }
 0x459   : > { %v1299_v42 = vpop.xlane.xlu0 %1298 }
 0x45a   : > { %2457 = vrcp.f32 %v1299_v42 }
 0x464   : > { %v2458_v43 = vpop.eup %2457 }
 0x465   : > { %v1301_v45 = vmul.f32 %v2458_v43, %v3478_v57  ;;  %v1510_v57 = vld [vmem:[%s3703_s23] sm:$0x3] (!%p1825_p9) }
 0x466   : > { %v1515_v62 = vrot.slane (!%p1825_p9), %v1510_v57, %v1514_v40  ;;  %v1519_v63 = vrot.slane (!%p1825_p9), %v1510_v57, %v1518_v58 }
 0x467   : > { %2135 = vmatmul.mubr.f32.vlgmr.msra.gmra.mrb[34].mxu0 %v1301_v45  ;;  %v1502_v46 = vadd.f32 %v1501_v44, %v1301_v45 }
 0x469   : > { %1503 = vst [vmem:[#allocation5] sm:$0xff] %v1502_v46 }
 0x470   : > { %v1526_v55 = vld [vmem:[#allocation5] sm:$0xff] (!%p1825_p9) }
 0x471   : > { %v1527_v59 = vmul.f32 (!%p1825_p9), 0.5, %v1526_v55 }
 0x473   : > { %1528 = vst [vmem:[%s3233_s13] sm:$0xff] (!%p1825_p9), %v1527_v59 }
 0x53a   : > { %v1385_v47 = vpop.f32.mrb[34].mxu0 }
 0x53b   : > { %v2136_v48 = vpop.f32.mrb[35].mxu0  ;;  %1491 = vmatmul.mubr.f32.vlgmr.msra.gmra.mrb[34].mxu1 %v1385_v47 }
 0x60c   : > { %1507 = sbr.rel (%p1825_p9) target bundleno = 1565 (0x61d), region = 104 }
 0x60e   : > { %v1492_v51 = vpop.f32.mrb[34].mxu1 }
 0x60f   : > { %v1497_v52 = vadd.f32 %v1492_v51, %v1389_v20  ;;  %v1494_v53 = vpop.f32.mrb[35].mxu1 }
 0x610   : > { %v1498_v54 = vadd.f32 %v1494_v53, %v1390_v50 }
 0x611   : > { %1499 = vst [vmem:[#allocation4] sm:$0xff] %v1497_v52 }
 0x612   : > { %1500 = vst [vmem:[#allocation4 + $0x8] sm:$0xff] %v1498_v54 }
 0x618   : > { %v1508_v60 = vld [vmem:[#allocation4] sm:$0xff] }
 0x619   : > { %v1509_v61 = vld [vmem:[#allocation4 + $0x8] sm:$0xff]  ;;  %v1522_v0 = vadd.f32 %v1515_v62, %v1508_v60 }
 0x61a   : > { %v1523_v1 = vadd.f32 %v1519_v63, %v1509_v61 }
 0x61b   : > { %1524 = vst [vmem:[%s3231_s28] sm:$0xff] %v1522_v0 }
 0x61c   : > { %1525 = vst [vmem:[%s3231_s28 + $0x8] sm:$0xff] %v1523_v1 }
 0x61d PF: > { %s3704_s16 = sld [smem:[#allocation30_spill]]  ;;  %s3705_s17 = sld [smem:[#allocation36_spill]] }
 0x61e   : > { %s3706_s11 = sld [smem:[#allocation46_spill]]  ;;  %s1551_s7 = sshll.u32 %s3231_s28, 4  ;;  %s1552_s7 = int_to_ptr.vmem [resolvable:$true] %s1551_s7 }
 0x61f   : > { %s1530_s3 = scalar_lea.sflag [#allocation8], %s3202_s10  ;;  %s2661_s9 = scalar_lea.vmem %s1552_s7, 256 }
 0x620   : > { %p2662_p10 = scmp.ne.s32.totalorder %s1552_s7, %s2661_s9  ;;  %s2820_s5 = smov [#allocation18]  }
 0x621   : > { %s2665_s29 = sshll.u32 %s2820_s5, 4  ;;  %s2666_s29 = int_to_ptr.vmem [resolvable:$false] %s2665_s29 }
 0x622   : > { %s2667_s1 = scalar_lea.vmem %s2666_s29, 512  ;;  %p2668_p0 = scmp.lt.s32.totalorder %s1552_s7, %s2666_s29 }
 0x623   : > { %s1837_s14 = sshll.u32 %s3704_s16, 8  ;;  %p3707_p2 = scmp.ne.s32.totalorder %s3705_s17, 0 }
 0x624   : > { %s3529_s25 = scalar_lea.hbm %s3706_s11, %s1837_s14  ;;  %p2669_p5 = scmp.lt.s32.totalorder %s2667_s1, %s2661_s9 }
 0x625   : > { %p2663_p11 = pnand %p2662_p10, %p3707_p2 }
 0x626   : > { %p2670_p12 = por %p2669_p5, %p2668_p0 }
 0x627   : > { %p2664_p8 = pneg %p2663_p11 }
 0x629   : > { %p2671_p13 = pnand %p2670_p12, %p2664_p8 }
 0x62b   : > { %2674 = shalt.err (!%p2671_p13)
}
 0x62c   : > { %s2675_s28 = scalar_lea.hbm %s3529_s25, 256  ;;  %s2679_s30 = scalar_lea.hbm %s3706_s11, 512 }
 0x62d   : > { %p2676_p3 = scmp.ne.s32.totalorder %s3529_s25, %s2675_s28  ;;  %p2680_p4 = scmp.lt.u32.totalorder %s3529_s25, %s3706_s11 }
 0x62e   : > { %p2681_p6 = scmp.lt.u32.totalorder %s2679_s30, %s2675_s28  ;;  %p2683_p10 = scmp.lt.u32.totalorder %s2675_s28, %s3529_s25 }
 0x62f   : > { %p2677_p7 = pnand %p2676_p3, %p3707_p2 }
 0x630   : > { %p2682_p9 = por %p2681_p6, %p2680_p4 }
 0x631   : > { %p2678_p1 = pneg %p2677_p7 }
 0x632   : > { %p2684_p11 = por %p2683_p10, %p2682_p9 }
 0x634   : > { %p2685_p8 = pnand %p2684_p11, %p2678_p1 }
 0x636   : > { %2688 = shalt.err (!%p2685_p8)
}
 0x637   : > { %2335 = dma.vmem_to_hbm [thread:$0]  (%p3707_p2), %s1552_s7, 256, %s3529_s25, %s1530_s3  }
 0x638   : > { %s1830_s19 = sshll.u32 %s3704_s16, 7  ;;  %s1565_s21 = sshll.u32 %s3233_s13, 4  ;;  %s1566_s21 = int_to_ptr.vmem [resolvable:$true] %s1565_s21 }
 0x639   : > { %s3708_s14 = sld [smem:[#allocation47_spill]]  ;;  %s1535_s18 = scalar_lea.sflag [#allocation20], %s3202_s10 }
 0x63a   : > { %s2689_s9 = scalar_lea.vmem %s1566_s21, 128  ;;  %s2821_s5 = smov [#allocation19]  }
 0x63b   : > { %p2690_p0 = scmp.ne.s32.totalorder %s1566_s21, %s2689_s9  ;;  %s2693_s29 = sshll.u32 %s2821_s5, 4  ;;  %s2694_s29 = int_to_ptr.vmem [resolvable:$false] %s2693_s29 }
 0x63c   : > { %s2695_s1 = scalar_lea.vmem %s2694_s29, 256  ;;  %p2696_p13 = scmp.lt.s32.totalorder %s1566_s21, %s2694_s29 }
 0x63d   : > { %p2691_p5 = pnand %p2690_p0, %p3707_p2  ;;  %p2697_p3 = scmp.lt.s32.totalorder %s2695_s1, %s2689_s9 }
 0x63f   : > { %s3555_s8 = scalar_lea.hbm %s3708_s14, %s1830_s19  ;;  %p2692_p12 = pneg %p2691_p5 }
 0x640   : > { %p2698_p7 = por %p2697_p3, %p2696_p13 }
 0x642   : > { %p2699_p1 = pnand %p2698_p7, %p2692_p12 }
 0x644   : > { %2702 = shalt.err (!%p2699_p1)
}
 0x645   : > { %s2703_s10 = scalar_lea.hbm %s3555_s8, 128  ;;  %s2707_s25 = scalar_lea.hbm %s3708_s14, 256 }
 0x646   : > { %p2704_p4 = scmp.ne.s32.totalorder %s3555_s8, %s2703_s10  ;;  %p2708_p10 = scmp.lt.u32.totalorder %s3555_s8, %s3708_s14 }
 0x647   : > { %p2709_p11 = scmp.lt.u32.totalorder %s2707_s25, %s2703_s10  ;;  %p2711_p0 = scmp.lt.u32.totalorder %s2703_s10, %s3555_s8 }
 0x648   : > { %p2705_p6 = pnand %p2704_p4, %p3707_p2 }
 0x649   : > { %p2710_p8 = por %p2709_p11, %p2708_p10 }
 0x64a   : > { %p2706_p9 = pneg %p2705_p6 }
 0x64b   : > { %p2712_p5 = por %p2711_p0, %p2710_p8 }
 0x64d   : > { %p2713_p12 = pnand %p2712_p5, %p2706_p9 }
 0x64f   : > { %2716 = shalt.err (!%p2713_p12)
}
 0x650   : > { %2336 = dma.vmem_to_hbm [thread:$0]  (%p3707_p2), %s1566_s21, 128, %s3555_s8, %s1535_s18  }
 0x651 PF: > { %s3709_s28 = sld [smem:[#allocation32_spill]]  ;;  %s3710_s24 = sld [smem:[#allocation27_spill]] }
 0x652   : > { %s3711_s20 = sld [smem:[#allocation34_spill]] }
 0x657   : > { %p2378_p13 = scmp.ge.s32.totalorder %s3709_s28, 2  ;;  %s1577_s30 = sand.u32 1, %s3710_s24  }
 0x658   : > { %p3712_p3 = scmp.ne.s32.totalorder %s3711_s20, 0  ;;  %s1578_s26 = scalar_lea.sflag [#allocation8], %s1577_s30 }
 0x65a   : > { %p2363_p7 = pnand %p2378_p13, %p3712_p3 }
 0x65c   : > { %2766 = dma.done.wait (!%p2363_p7), %s1578_s26, 256  }
 0x65d   : > { %2768 = vsyncadd (!%p2363_p7), %s1578_s26, 4294967040  ;;  %s1587_s15 = scalar_lea.sflag [#allocation20], %s1577_s30 }
 0x65e   : > { %2770 = dma.done.wait (!%p2363_p7), %s1587_s15, 128  }
 0x65f   : > { %2772 = vsyncadd (!%p2363_p7), %s1587_s15, 4294967168  ;;  %s37_s28 = sadd.s32 1, %s3709_s28   ;;  %s3713_s17 = sld [smem:[#allocation28_spill]] }
 0x660   : > { %p34_p1 = scmp.ge.s32.totalorder %s37_s28, 6   ;;  %s3714_s23 = sld [smem:[#allocation38_spill]] }
 0x661   : > { %s3715_s24 = sld [smem:[#allocation31_spill]]  ;;  %s3716_s26 = sld [smem:[#allocation35_spill]] }
 0x662   : > { %s3717_s19 = sld [smem:[#allocation37_spill]]  ;;  %s3718_s21 = smov %s2779_s22 }
 0x663   : > { %s3720_s25 = smov %s2799_s27  ;;  %36 = sbr.rel (!%p34_p1) target bundleno = 23 (0x17), region = 189 }
 0x665   : > { %s3719_s22 = smov %s3713_s17 }
 0x668   : > { %s3721_s27 = smov %s3717_s19 }
 0x66a   :  { %1592 = vsyncpa [#allocation7], 1 }
 0x66b   :  { %1594 = vsyncpa [#allocation7 + $0x1], 1 }
 0x66c   :  { %1595 = vsyncpa [#allocation10], 1 }
 0x66d   :  { %1597 = vsyncpa [#allocation10 + $0x1], 1 }
 0x66e   :  { %1598 = vsyncpa [#allocation13], 1 }
 0x66f   :  { %1599 = vsyncpa [#allocation16], 1 }
 0x670   :  { %1600 = vsyncpa [#allocation8], 1 }
 0x671   :  { %1602 = vsyncpa [#allocation8 + $0x1], 1 }
 0x672   :  { %1603 = vsyncpa [#allocation20], 1 }
 0x673   :  { %1605 = vsyncpa [#allocation20 + $0x1], 1 }

</bundles_post_ra>
